<compile_context>
chip_gen: v7x
topology: tpu7x:2x2x1
jax: 0.10.0
libtpu: 0.0.40
codegen_flags: <defaults>
</compile_context>

<pallas_src>
import functools

import jax
import jax.numpy as jnp
from jax.experimental import pallas as pl
from jax.experimental.pallas import tpu as pltpu


def original_lstm_kernel(
    x_ref,                        # (T*Bp, F)   already flattened in the wrapper
    wih0_ref, whh0_ref, b0_ref,   # (F,4H), (H,4H), (1,4H)  [i/f/o cols pre-scaled 0.5]
    wl1_ref, b1_ref,              # (2H,4H) = [W_ih1; W_hh1], (1,4H)  [pre-scaled 0.5]
    aw1_ref, ab1_ref,             # (H,H), (1,H)
    aw2_ref, ab2_ref,             # (1,H), (1,1)
    fw1_ref, fb1_ref,             # (H,H//2), (1,H//2)
    fw2_ref, fb2_ref,             # (H//2,1), (1,1)
    out_ref,                      # (Bp, 1)
    xg0_ref,                      # scratch VMEM (T*Bp, 4H): hoisted layer-0 input gates
    outs1_ref,                    # scratch VMEM (T*Bp, H):  layer-1 hidden states
):
    TB, F = x_ref.shape
    H4 = whh0_ref.shape[1]
    H = H4 // 4
    Bp = out_ref.shape[0]
    T = TB // Bp
    f32 = jnp.float32
    wdt = whh0_ref.dtype          # matmul-operand dtype (f32, or bf16 on v6e/v7x)

    # ---- hoisted layer-0 input projection: one tall matmul, no reshapes ----
    xg0_ref[...] = (jnp.dot(x_ref[...].astype(wdt), wih0_ref[...],
                            preferred_element_type=f32) + b0_ref[...])

    whh0 = whh0_ref[...]
    wl1 = wl1_ref[...]
    b1 = jnp.broadcast_to(b1_ref[...], (Bp, H4))        # hoisted broadcast

    def gate_update(gates, c):
        # i/f/o columns of `gates` hold z/2 (weights pre-scaled), so one
        # full-width tanh + cheap affine fixup replaces 3 sigmoids + 1 tanh.
        t = jnp.tanh(gates)
        i = 0.5 * t[:, 0 * H:1 * H] + 0.5
        f = 0.5 * t[:, 1 * H:2 * H] + 0.5
        g = t[:, 2 * H:3 * H]
        o = 0.5 * t[:, 3 * H:4 * H] + 0.5
        c_new = f * c + i * g
        h_new = o * jnp.tanh(c_new)
        return h_new, c_new

    def body(t, carry):
        h0, c0, h1, c1 = carry
        row = pl.multiple_of(t * Bp, Bp)                 # aligned row offset (Bp % 8 == 0)
        # layer 0: only the recurrent matmul sits on the per-step critical path
        g0 = (xg0_ref[pl.ds(row, Bp), :]
              + jnp.dot(h0.astype(wdt), whh0, preferred_element_type=f32))
        h0, c0 = gate_update(g0, c0)
        # layer 1: single fused (Bp,2H)x(2H,4H) matmul (dropout between layers
        # is identity in eval mode)
        g1 = (jnp.dot(jnp.concatenate([h0, h1], axis=1).astype(wdt), wl1,
                      preferred_element_type=f32) + b1)
        h1, c1 = gate_update(g1, c1)
        outs1_ref[pl.ds(row, Bp), :] = h1
        return (h0, c0, h1, c1)

    z0 = jnp.zeros((Bp, H), f32)
    unroll = True if T <= 16 else 4
    jax.lax.fori_loop(0, T, body, (z0, z0, z0, z0), unroll=unroll)

    # ---- attention: Linear -> Tanh -> Linear -> Softmax(seq), fully batched ----
    outs2d = outs1_ref[...]                                          # (T*Bp, H) f32
    e = jnp.tanh(jnp.dot(outs2d.astype(wdt), aw1_ref[...],
                         preferred_element_type=f32) + ab1_ref[...])
    s = jnp.sum(e * aw2_ref[...], axis=-1, keepdims=True) + ab2_ref[...]   # (T*Bp, 1)
    s3 = s.reshape(T, Bp, 1)                                         # leading-dim split only
    m = jnp.max(s3, axis=0, keepdims=True)
    ex = jnp.exp(s3 - m)
    denom = jnp.sum(ex, axis=0, keepdims=True)
    attn = ex * pl.reciprocal(denom, approx=True)                    # softmax over seq (EUP)
    ctx = jnp.sum(attn * outs2d.reshape(T, Bp, H), axis=0)           # (Bp, H)

    # ---- fc head: Linear -> ReLU -> (Dropout = identity) -> Linear -> Sigmoid ----
    h1h = jnp.maximum(
        jnp.dot(ctx.astype(wdt), fw1_ref[...], preferred_element_type=f32)
        + fb1_ref[...], 0.0)
    y = jax.nn.sigmoid(
        jnp.dot(h1h.astype(wdt), fw2_ref[...], preferred_element_type=f32)
        + fb2_ref[...])
    out_ref[...] = y.astype(out_ref.dtype)


def init_params(key, input_size, hidden_size):
    """Deterministic synthetic parameters (PyTorch-style uniform init, raw layout)."""
    H = hidden_size
    k_lstm = 1.0 / jnp.sqrt(H)

    def u(key, shape, scale):
        return jax.random.uniform(key, shape, jnp.float32, -scale, scale)

    keys = jax.random.split(key, 16)
    p = {}
    # LSTM layer 0
    p["wih0"] = u(keys[0], (4 * H, input_size), k_lstm)
    p["whh0"] = u(keys[1], (4 * H, H), k_lstm)
    p["b0"] = u(keys[2], (4 * H,), k_lstm) + u(keys[3], (4 * H,), k_lstm)  # b_ih + b_hh
    # LSTM layer 1
    p["wih1"] = u(keys[4], (4 * H, H), k_lstm)
    p["whh1"] = u(keys[5], (4 * H, H), k_lstm)
    p["b1"] = u(keys[6], (4 * H,), k_lstm) + u(keys[7], (4 * H,), k_lstm)
    # attention
    p["aw1"] = u(keys[8], (H, H), 1.0 / jnp.sqrt(H))
    p["ab1"] = u(keys[9], (H,), 1.0 / jnp.sqrt(H))
    p["aw2"] = u(keys[10], (1, H), 1.0 / jnp.sqrt(H))
    p["ab2"] = u(keys[11], (1,), 1.0 / jnp.sqrt(H))
    # fc head
    p["fw1"] = u(keys[12], (H // 2, H), 1.0 / jnp.sqrt(H))
    p["fb1"] = u(keys[13], (H // 2,), 1.0 / jnp.sqrt(H))
    p["fw2"] = u(keys[14], (1, H // 2), 1.0 / jnp.sqrt(H // 2))
    p["fb2"] = u(keys[15], (1,), 1.0 / jnp.sqrt(H // 2))
    return p


def pack_params(params, compute_dtype=jnp.float32):
    """One-time (outside jit) packing:
       - transpose to (in, out),
       - fold the 0.5 sigmoid-via-tanh pre-scale into the i/f/o gate columns
         (PyTorch gate order i, f, g, o),
       - FUSE layer-1's W_ih1 / W_hh1 vertically into a single (2H, 4H) matrix,
       - optionally store weight MATRICES in bf16 (v6e/v7x MXU operands);
         biases and all elementwise math stay f32."""
    H = params["whh0"].shape[1]
    gate_scale = jnp.concatenate([
        jnp.full((H,), 0.5), jnp.full((H,), 0.5),
        jnp.ones((H,)), jnp.full((H,), 0.5)]).astype(jnp.float32)

    def sc(w):                    # w: (..., 4H)
        return (w * gate_scale).astype(jnp.float32)

    cd = compute_dtype
    wl1 = jnp.concatenate([sc(params["wih1"].T), sc(params["whh1"].T)], axis=0)
    return dict(
        wih0=sc(params["wih0"].T).astype(cd),              # (F, 4H)
        whh0=sc(params["whh0"].T).astype(cd),              # (H, 4H)
        b0=sc(params["b0"].reshape(1, -1)),                # (1, 4H)  f32
        wl1=wl1.astype(cd),                                # (2H, 4H) fused layer-1
        b1=sc(params["b1"].reshape(1, -1)),                # (1, 4H)  f32
        aw1=params["aw1"].T.astype(cd),                    # (H, H)
        ab1=params["ab1"].reshape(1, -1).astype(jnp.float32),   # (1, H)
        aw2=params["aw2"].reshape(1, -1).astype(jnp.float32),   # (1, H)  elementwise -> f32
        ab2=params["ab2"].reshape(1, 1).astype(jnp.float32),    # (1, 1)
        fw1=params["fw1"].T.astype(cd),                    # (H, H//2)
        fb1=params["fb1"].reshape(1, -1).astype(jnp.float32),   # (1, H//2)
        fw2=params["fw2"].T.astype(cd),                    # (H//2, 1)
        fb2=params["fb2"].reshape(1, 1).astype(jnp.float32),    # (1, 1)
    )


@jax.jit
def original_lstm_forward(x, packed):
    """x: (B, T, F) batch_first, float32.  Returns (B, 1) float32."""
    B, T, F = x.shape
    H4 = packed["whh0"].shape[1]
    H = H4 // 4
    Bp = max(8, ((B + 7) // 8) * 8)          # pad batch to a full sublane group

    # Wrapper-side layout work (free in XLA): (B,T,F) -> (T,Bp,F) -> flat (T*Bp,F),
    # so the kernel never reshapes a VMEM ref.
    x_t = jnp.transpose(x, (1, 0, 2))
    if Bp != B:
        x_t = jnp.pad(x_t, ((0, 0), (0, Bp - B), (0, 0)))
    x2d = x_t.reshape(T * Bp, F).astype(jnp.float32)

    vmem = pl.BlockSpec(memory_space=pltpu.MemorySpace.VMEM)
    args = (x2d,
            packed["wih0"], packed["whh0"], packed["b0"],
            packed["wl1"], packed["b1"],
            packed["aw1"], packed["ab1"], packed["aw2"], packed["ab2"],
            packed["fw1"], packed["fb1"], packed["fw2"], packed["fb2"])
    # Single gridless call: weights + per-seq activations are tiny and fully
    # VMEM-resident (scratch = T*Bp*(4H+H)*4 bytes ~= 40 KiB here).
    # TODO(synk): for large B on v7x add a batch-block grid with
    # dimension_semantics=("parallel",) to use both TensorCores, and chunk /
    # bf16 the (T*Bp,4H) scratch when it approaches the scoped-VMEM limit.
    out = pl.pallas_call(
        original_lstm_kernel,
        out_shape=jax.ShapeDtypeStruct((Bp, 1), jnp.float32),
        in_specs=[vmem] * len(args),
        out_specs=vmem,
        scratch_shapes=[
            pltpu.VMEM((T * Bp, H4), jnp.float32),   # hoisted layer-0 input gates
            pltpu.VMEM((T * Bp, H), jnp.float32),    # layer-1 outputs for attention
        ],
    )(*args)
    return out[:B]


def reference_forward(x, params):
    """Pure-JAX reference of the PyTorch forward (eval mode), raw param layout."""
    B, T, F = x.shape
    H = params["whh0"].shape[1]

    def run_layer(seq, wih, whh, b):
        h = jnp.zeros((B, H), jnp.float32)
        c = jnp.zeros((B, H), jnp.float32)
        outs = []
        for t in range(T):
            g = seq[t] @ wih.T + h @ whh.T + b
            i, f, gg, o = jnp.split(g, 4, axis=1)
            c = jax.nn.sigmoid(f) * c + jax.nn.sigmoid(i) * jnp.tanh(gg)
            h = jax.nn.sigmoid(o) * jnp.tanh(c)
            outs.append(h)
        return outs

    seq = [x[:, t, :] for t in range(T)]
    o0 = run_layer(seq, params["wih0"], params["whh0"], params["b0"])
    o1 = run_layer(o0, params["wih1"], params["whh1"], params["b1"])
    lstm_out = jnp.stack(o1, axis=1)                              # (B, T, H)
    e = jnp.tanh(lstm_out @ params["aw1"].T + params["ab1"])
    s = e @ params["aw2"].T + params["ab2"]                       # (B, T, 1)
    w = jax.nn.softmax(s, axis=1)
    ctx = jnp.sum(w * lstm_out, axis=1)                           # (B, H)
    h1 = jnp.maximum(ctx @ params["fw1"].T + params["fb1"], 0.0)
    return jax.nn.sigmoid(h1 @ params["fw2"].T + params["fb2"])   # (B, 1)


if __name__ == "__main__":
    B, T, INPUT_SIZE, HIDDEN = 2, 8, 9, 32
    key = jax.random.PRNGKey(0)
    kx, kp = jax.random.split(key)
    x = jax.random.normal(kx, (B, T, INPUT_SIZE), jnp.float32)
    params = init_params(kp, INPUT_SIZE, HIDDEN)
    ref = reference_forward(x, params)

    # f32 matmul operands (v5e default / reference-accurate path)
    packed_f32 = pack_params(params, compute_dtype=jnp.float32)
    out = jax.block_until_ready(original_lstm_forward(x, packed_f32))
    assert out.shape == (B, 1)
    assert jnp.allclose(out, ref, atol=2e-3, rtol=2e-3), (out, ref)

    # bf16 matmul operands (v6e/v7x path): f32 gate/cell/softmax math, f32 accum.
    packed_bf16 = pack_params(params, compute_dtype=jnp.bfloat16)
    out_bf16 = jax.block_until_ready(original_lstm_forward(x, packed_bf16))
    assert out_bf16.shape == (B, 1)
    assert jnp.allclose(out_bf16, ref, atol=2e-2, rtol=2e-2), (out_bf16, ref)

    print("KERNEL_OK")
</pallas_src>

<mosaic_0001>
module attributes {stable_mosaic.version = 11 : i64} {
  func.func @original_lstm_kernel(%arg0: memref<64x9xf32, #tpu.memory_space<vmem>>, %arg1: memref<9x128xf32, #tpu.memory_space<vmem>>, %arg2: memref<32x128xf32, #tpu.memory_space<vmem>>, %arg3: memref<1x128xf32, #tpu.memory_space<vmem>>, %arg4: memref<64x128xf32, #tpu.memory_space<vmem>>, %arg5: memref<1x128xf32, #tpu.memory_space<vmem>>, %arg6: memref<32x32xf32, #tpu.memory_space<vmem>>, %arg7: memref<1x32xf32, #tpu.memory_space<vmem>>, %arg8: memref<1x32xf32, #tpu.memory_space<vmem>>, %arg9: memref<1x1xf32, #tpu.memory_space<vmem>>, %arg10: memref<32x16xf32, #tpu.memory_space<vmem>>, %arg11: memref<1x16xf32, #tpu.memory_space<vmem>>, %arg12: memref<16x1xf32, #tpu.memory_space<vmem>>, %arg13: memref<1x1xf32, #tpu.memory_space<vmem>>, %arg14: memref<8x1xf32, #tpu.memory_space<vmem>>, %arg15: memref<64x128xf32, #tpu.memory_space<vmem>>, %arg16: memref<64x32xf32, #tpu.memory_space<vmem>>) attributes {dimension_semantics = [], scalar_prefetch = 0 : i64, scratch_operands = 2 : i64, tpu.core_type = #tpu.core_type<tc>} {
    %c0 = arith.constant 0 : index
    %c0_0 = arith.constant 0 : index
    %0 = vector.load %arg0[%c0, %c0_0] : memref<64x9xf32, #tpu.memory_space<vmem>>, vector<64x9xf32>
    %c0_1 = arith.constant 0 : index
    %c0_2 = arith.constant 0 : index
    %1 = vector.load %arg1[%c0_1, %c0_2] : memref<9x128xf32, #tpu.memory_space<vmem>>, vector<9x128xf32>
    %cst = arith.constant dense<0.000000e+00> : vector<64x128xf32>
    %2 = tpu.matmul %0, %1, %cst {dimension_numbers = #tpu.dot_dimension_numbers<[1], [0], [0], [1], [0, 0, 1, 1], [], []>} : vector<64x9xf32>, vector<9x128xf32>, vector<64x128xf32> -> vector<64x128xf32>
    %c0_3 = arith.constant 0 : index
    %c0_4 = arith.constant 0 : index
    %3 = vector.load %arg3[%c0_3, %c0_4] : memref<1x128xf32, #tpu.memory_space<vmem>>, vector<1x128xf32>
    %4 = vector.broadcast %3 : vector<1x128xf32> to vector<64x128xf32>
    %5 = arith.addf %2, %4 : vector<64x128xf32>
    %c0_5 = arith.constant 0 : index
    %c0_6 = arith.constant 0 : index
    %6 = vector.load %arg15[%c0_5, %c0_6] : memref<64x128xf32, #tpu.memory_space<vmem>>, vector<64x128xf32>
    tpu.vector_store %arg15[%c0_5, %c0_6], %5 {strides = array<i32>} : memref<64x128xf32, #tpu.memory_space<vmem>>, vector<64x128xf32>,
    %c0_7 = arith.constant 0 : index
    %c0_8 = arith.constant 0 : index
    %7 = vector.load %arg2[%c0_7, %c0_8] : memref<32x128xf32, #tpu.memory_space<vmem>>, vector<32x128xf32>
    %c0_9 = arith.constant 0 : index
    %c0_10 = arith.constant 0 : index
    %8 = vector.load %arg4[%c0_9, %c0_10] : memref<64x128xf32, #tpu.memory_space<vmem>>, vector<64x128xf32>
    %c0_11 = arith.constant 0 : index
    %c0_12 = arith.constant 0 : index
    %9 = vector.load %arg5[%c0_11, %c0_12] : memref<1x128xf32, #tpu.memory_space<vmem>>, vector<1x128xf32>
    %10 = vector.shape_cast %9 : vector<1x128xf32> to vector<1x128xf32>
    %11 = vector.broadcast %10 : vector<1x128xf32> to vector<8x128xf32>
    %cst_13 = arith.constant 0.000000e+00 : f32
    %12 = vector.broadcast %cst_13 : f32 to vector<8x32xf32>
    %c0_i32 = arith.constant 0 : i32
    %c8_i32 = arith.constant 8 : i32
    %13 = arith.muli %c0_i32, %c8_i32 : i32
    %14 = tpu.assume_multiple %13, 8 : i32
    %15 = arith.index_cast %14 : i32 to index
    %c0_14 = arith.constant 0 : index
    %16 = vector.load %arg15[%15, %c0_14] : memref<64x128xf32, #tpu.memory_space<vmem>>, vector<8x128xf32>
    %cst_15 = arith.constant dense<0.000000e+00> : vector<8x128xf32>
    %17 = tpu.matmul %12, %7, %cst_15 {dimension_numbers = #tpu.dot_dimension_numbers<[1], [0], [0], [1], [0, 0, 1, 1], [], []>} : vector<8x32xf32>, vector<32x128xf32>, vector<8x128xf32> -> vector<8x128xf32>
    %18 = arith.addf %16, %17 : vector<8x128xf32>
    %19 = math.tanh %18 : vector<8x128xf32>
    %20 = vector.extract_strided_slice %19 {offsets = [0, 0], sizes = [8, 32], strides = [1, 1]} : vector<8x128xf32> to vector<8x32xf32>
    %cst_16 = arith.constant 5.000000e-01 : f32
    %21 = vector.broadcast %cst_16 : f32 to vector<8x32xf32>
    %22 = arith.mulf %21, %20 : vector<8x32xf32>
    %cst_17 = arith.constant 5.000000e-01 : f32
    %23 = vector.broadcast %cst_17 : f32 to vector<8x32xf32>
    %24 = arith.addf %22, %23 : vector<8x32xf32>
    %25 = vector.extract_strided_slice %19 {offsets = [0, 32], sizes = [8, 32], strides = [1, 1]} : vector<8x128xf32> to vector<8x32xf32>
    %cst_18 = arith.constant 5.000000e-01 : f32
    %26 = vector.broadcast %cst_18 : f32 to vector<8x32xf32>
    %27 = arith.mulf %26, %25 : vector<8x32xf32>
    %cst_19 = arith.constant 5.000000e-01 : f32
    %28 = vector.broadcast %cst_19 : f32 to vector<8x32xf32>
    %29 = arith.addf %27, %28 : vector<8x32xf32>
    %30 = vector.extract_strided_slice %19 {offsets = [0, 64], sizes = [8, 32], strides = [1, 1]} : vector<8x128xf32> to vector<8x32xf32>
    %31 = vector.extract_strided_slice %19 {offsets = [0, 96], sizes = [8, 32], strides = [1, 1]} : vector<8x128xf32> to vector<8x32xf32>
    %cst_20 = arith.constant 5.000000e-01 : f32
    %32 = vector.broadcast %cst_20 : f32 to vector<8x32xf32>
    %33 = arith.mulf %32, %31 : vector<8x32xf32>
    %cst_21 = arith.constant 5.000000e-01 : f32
    %34 = vector.broadcast %cst_21 : f32 to vector<8x32xf32>
    %35 = arith.addf %33, %34 : vector<8x32xf32>
    %36 = arith.mulf %29, %12 : vector<8x32xf32>
    %37 = arith.mulf %24, %30 : vector<8x32xf32>
    %38 = arith.addf %36, %37 : vector<8x32xf32>
    %39 = math.tanh %38 : vector<8x32xf32>
    %40 = arith.mulf %35, %39 : vector<8x32xf32>
    %41 = tpu.concatenate %40, %12 in 1 : vector<8x32xf32>, vector<8x32xf32> -> vector<8x64xf32>
    %cst_22 = arith.constant dense<0.000000e+00> : vector<8x128xf32>
    %42 = tpu.matmul %41, %8, %cst_22 {dimension_numbers = #tpu.dot_dimension_numbers<[1], [0], [0], [1], [0, 0, 1, 1], [], []>} : vector<8x64xf32>, vector<64x128xf32>, vector<8x128xf32> -> vector<8x128xf32>
    %43 = arith.addf %42, %11 : vector<8x128xf32>
    %44 = math.tanh %43 : vector<8x128xf32>
    %45 = vector.extract_strided_slice %44 {offsets = [0, 0], sizes = [8, 32], strides = [1, 1]} : vector<8x128xf32> to vector<8x32xf32>
    %cst_23 = arith.constant 5.000000e-01 : f32
    %46 = vector.broadcast %cst_23 : f32 to vector<8x32xf32>
    %47 = arith.mulf %46, %45 : vector<8x32xf32>
    %cst_24 = arith.constant 5.000000e-01 : f32
    %48 = vector.broadcast %cst_24 : f32 to vector<8x32xf32>
    %49 = arith.addf %47, %48 : vector<8x32xf32>
    %50 = vector.extract_strided_slice %44 {offsets = [0, 32], sizes = [8, 32], strides = [1, 1]} : vector<8x128xf32> to vector<8x32xf32>
    %cst_25 = arith.constant 5.000000e-01 : f32
    %51 = vector.broadcast %cst_25 : f32 to vector<8x32xf32>
    %52 = arith.mulf %51, %50 : vector<8x32xf32>
    %cst_26 = arith.constant 5.000000e-01 : f32
    %53 = vector.broadcast %cst_26 : f32 to vector<8x32xf32>
    %54 = arith.addf %52, %53 : vector<8x32xf32>
    %55 = vector.extract_strided_slice %44 {offsets = [0, 64], sizes = [8, 32], strides = [1, 1]} : vector<8x128xf32> to vector<8x32xf32>
    %56 = vector.extract_strided_slice %44 {offsets = [0, 96], sizes = [8, 32], strides = [1, 1]} : vector<8x128xf32> to vector<8x32xf32>
    %cst_27 = arith.constant 5.000000e-01 : f32
    %57 = vector.broadcast %cst_27 : f32 to vector<8x32xf32>
    %58 = arith.mulf %57, %56 : vector<8x32xf32>
    %cst_28 = arith.constant 5.000000e-01 : f32
    %59 = vector.broadcast %cst_28 : f32 to vector<8x32xf32>
    %60 = arith.addf %58, %59 : vector<8x32xf32>
    %61 = arith.mulf %54, %12 : vector<8x32xf32>
    %62 = arith.mulf %49, %55 : vector<8x32xf32>
    %63 = arith.addf %61, %62 : vector<8x32xf32>
    %64 = math.tanh %63 : vector<8x32xf32>
    %65 = arith.mulf %60, %64 : vector<8x32xf32>
    %66 = arith.index_cast %14 : i32 to index
    %c0_29 = arith.constant 0 : index
    %67 = vector.load %arg16[%66, %c0_29] : memref<64x32xf32, #tpu.memory_space<vmem>>, vector<8x32xf32>
    tpu.vector_store %arg16[%66, %c0_29], %65 {strides = array<i32>} : memref<64x32xf32, #tpu.memory_space<vmem>>, vector<8x32xf32>,
    %c1_i32 = arith.constant 1 : i32
    %c8_i32_30 = arith.constant 8 : i32
    %68 = arith.muli %c1_i32, %c8_i32_30 : i32
    %69 = tpu.assume_multiple %68, 8 : i32
    %70 = arith.index_cast %69 : i32 to index
    %c0_31 = arith.constant 0 : index
    %71 = vector.load %arg15[%70, %c0_31] : memref<64x128xf32, #tpu.memory_space<vmem>>, vector<8x128xf32>
    %cst_32 = arith.constant dense<0.000000e+00> : vector<8x128xf32>
    %72 = tpu.matmul %40, %7, %cst_32 {dimension_numbers = #tpu.dot_dimension_numbers<[1], [0], [0], [1], [0, 0, 1, 1], [], []>} : vector<8x32xf32>, vector<32x128xf32>, vector<8x128xf32> -> vector<8x128xf32>
    %73 = arith.addf %71, %72 : vector<8x128xf32>
    %74 = math.tanh %73 : vector<8x128xf32>
    %75 = vector.extract_strided_slice %74 {offsets = [0, 0], sizes = [8, 32], strides = [1, 1]} : vector<8x128xf32> to vector<8x32xf32>
    %cst_33 = arith.constant 5.000000e-01 : f32
    %76 = vector.broadcast %cst_33 : f32 to vector<8x32xf32>
    %77 = arith.mulf %76, %75 : vector<8x32xf32>
    %cst_34 = arith.constant 5.000000e-01 : f32
    %78 = vector.broadcast %cst_34 : f32 to vector<8x32xf32>
    %79 = arith.addf %77, %78 : vector<8x32xf32>
    %80 = vector.extract_strided_slice %74 {offsets = [0, 32], sizes = [8, 32], strides = [1, 1]} : vector<8x128xf32> to vector<8x32xf32>
    %cst_35 = arith.constant 5.000000e-01 : f32
    %81 = vector.broadcast %cst_35 : f32 to vector<8x32xf32>
    %82 = arith.mulf %81, %80 : vector<8x32xf32>
    %cst_36 = arith.constant 5.000000e-01 : f32
    %83 = vector.broadcast %cst_36 : f32 to vector<8x32xf32>
    %84 = arith.addf %82, %83 : vector<8x32xf32>
    %85 = vector.extract_strided_slice %74 {offsets = [0, 64], sizes = [8, 32], strides = [1, 1]} : vector<8x128xf32> to vector<8x32xf32>
    %86 = vector.extract_strided_slice %74 {offsets = [0, 96], sizes = [8, 32], strides = [1, 1]} : vector<8x128xf32> to vector<8x32xf32>
    %cst_37 = arith.constant 5.000000e-01 : f32
    %87 = vector.broadcast %cst_37 : f32 to vector<8x32xf32>
    %88 = arith.mulf %87, %86 : vector<8x32xf32>
    %cst_38 = arith.constant 5.000000e-01 : f32
    %89 = vector.broadcast %cst_38 : f32 to vector<8x32xf32>
    %90 = arith.addf %88, %89 : vector<8x32xf32>
    %91 = arith.mulf %84, %38 : vector<8x32xf32>
    %92 = arith.mulf %79, %85 : vector<8x32xf32>
    %93 = arith.addf %91, %92 : vector<8x32xf32>
    %94 = math.tanh %93 : vector<8x32xf32>
    %95 = arith.mulf %90, %94 : vector<8x32xf32>
    %96 = tpu.concatenate %95, %65 in 1 : vector<8x32xf32>, vector<8x32xf32> -> vector<8x64xf32>
    %cst_39 = arith.constant dense<0.000000e+00> : vector<8x128xf32>
    %97 = tpu.matmul %96, %8, %cst_39 {dimension_numbers = #tpu.dot_dimension_numbers<[1], [0], [0], [1], [0, 0, 1, 1], [], []>} : vector<8x64xf32>, vector<64x128xf32>, vector<8x128xf32> -> vector<8x128xf32>
    %98 = arith.addf %97, %11 : vector<8x128xf32>
    %99 = math.tanh %98 : vector<8x128xf32>
    %100 = vector.extract_strided_slice %99 {offsets = [0, 0], sizes = [8, 32], strides = [1, 1]} : vector<8x128xf32> to vector<8x32xf32>
    %cst_40 = arith.constant 5.000000e-01 : f32
    %101 = vector.broadcast %cst_40 : f32 to vector<8x32xf32>
    %102 = arith.mulf %101, %100 : vector<8x32xf32>
    %cst_41 = arith.constant 5.000000e-01 : f32
    %103 = vector.broadcast %cst_41 : f32 to vector<8x32xf32>
    %104 = arith.addf %102, %103 : vector<8x32xf32>
    %105 = vector.extract_strided_slice %99 {offsets = [0, 32], sizes = [8, 32], strides = [1, 1]} : vector<8x128xf32> to vector<8x32xf32>
    %cst_42 = arith.constant 5.000000e-01 : f32
    %106 = vector.broadcast %cst_42 : f32 to vector<8x32xf32>
    %107 = arith.mulf %106, %105 : vector<8x32xf32>
    %cst_43 = arith.constant 5.000000e-01 : f32
    %108 = vector.broadcast %cst_43 : f32 to vector<8x32xf32>
    %109 = arith.addf %107, %108 : vector<8x32xf32>
    %110 = vector.extract_strided_slice %99 {offsets = [0, 64], sizes = [8, 32], strides = [1, 1]} : vector<8x128xf32> to vector<8x32xf32>
    %111 = vector.extract_strided_slice %99 {offsets = [0, 96], sizes = [8, 32], strides = [1, 1]} : vector<8x128xf32> to vector<8x32xf32>
    %cst_44 = arith.constant 5.000000e-01 : f32
    %112 = vector.broadcast %cst_44 : f32 to vector<8x32xf32>
    %113 = arith.mulf %112, %111 : vector<8x32xf32>
    %cst_45 = arith.constant 5.000000e-01 : f32
    %114 = vector.broadcast %cst_45 : f32 to vector<8x32xf32>
    %115 = arith.addf %113, %114 : vector<8x32xf32>
    %116 = arith.mulf %109, %63 : vector<8x32xf32>
    %117 = arith.mulf %104, %110 : vector<8x32xf32>
    %118 = arith.addf %116, %117 : vector<8x32xf32>
    %119 = math.tanh %118 : vector<8x32xf32>
    %120 = arith.mulf %115, %119 : vector<8x32xf32>
    %121 = arith.index_cast %69 : i32 to index
    %c0_46 = arith.constant 0 : index
    %122 = vector.load %arg16[%121, %c0_46] : memref<64x32xf32, #tpu.memory_space<vmem>>, vector<8x32xf32>
    tpu.vector_store %arg16[%121, %c0_46], %120 {strides = array<i32>} : memref<64x32xf32, #tpu.memory_space<vmem>>, vector<8x32xf32>,
    %c2_i32 = arith.constant 2 : i32
    %c8_i32_47 = arith.constant 8 : i32
    %123 = arith.muli %c2_i32, %c8_i32_47 : i32
    %124 = tpu.assume_multiple %123, 8 : i32
    %125 = arith.index_cast %124 : i32 to index
    %c0_48 = arith.constant 0 : index
    %126 = vector.load %arg15[%125, %c0_48] : memref<64x128xf32, #tpu.memory_space<vmem>>, vector<8x128xf32>
    %cst_49 = arith.constant dense<0.000000e+00> : vector<8x128xf32>
    %127 = tpu.matmul %95, %7, %cst_49 {dimension_numbers = #tpu.dot_dimension_numbers<[1], [0], [0], [1], [0, 0, 1, 1], [], []>} : vector<8x32xf32>, vector<32x128xf32>, vector<8x128xf32> -> vector<8x128xf32>
    %128 = arith.addf %126, %127 : vector<8x128xf32>
    %129 = math.tanh %128 : vector<8x128xf32>
    %130 = vector.extract_strided_slice %129 {offsets = [0, 0], sizes = [8, 32], strides = [1, 1]} : vector<8x128xf32> to vector<8x32xf32>
    %cst_50 = arith.constant 5.000000e-01 : f32
    %131 = vector.broadcast %cst_50 : f32 to vector<8x32xf32>
    %132 = arith.mulf %131, %130 : vector<8x32xf32>
    %cst_51 = arith.constant 5.000000e-01 : f32
    %133 = vector.broadcast %cst_51 : f32 to vector<8x32xf32>
    %134 = arith.addf %132, %133 : vector<8x32xf32>
    %135 = vector.extract_strided_slice %129 {offsets = [0, 32], sizes = [8, 32], strides = [1, 1]} : vector<8x128xf32> to vector<8x32xf32>
    %cst_52 = arith.constant 5.000000e-01 : f32
    %136 = vector.broadcast %cst_52 : f32 to vector<8x32xf32>
    %137 = arith.mulf %136, %135 : vector<8x32xf32>
    %cst_53 = arith.constant 5.000000e-01 : f32
    %138 = vector.broadcast %cst_53 : f32 to vector<8x32xf32>
    %139 = arith.addf %137, %138 : vector<8x32xf32>
    %140 = vector.extract_strided_slice %129 {offsets = [0, 64], sizes = [8, 32], strides = [1, 1]} : vector<8x128xf32> to vector<8x32xf32>
    %141 = vector.extract_strided_slice %129 {offsets = [0, 96], sizes = [8, 32], strides = [1, 1]} : vector<8x128xf32> to vector<8x32xf32>
    %cst_54 = arith.constant 5.000000e-01 : f32
    %142 = vector.broadcast %cst_54 : f32 to vector<8x32xf32>
    %143 = arith.mulf %142, %141 : vector<8x32xf32>
    %cst_55 = arith.constant 5.000000e-01 : f32
    %144 = vector.broadcast %cst_55 : f32 to vector<8x32xf32>
    %145 = arith.addf %143, %144 : vector<8x32xf32>
    %146 = arith.mulf %139, %93 : vector<8x32xf32>
    %147 = arith.mulf %134, %140 : vector<8x32xf32>
    %148 = arith.addf %146, %147 : vector<8x32xf32>
    %149 = math.tanh %148 : vector<8x32xf32>
    %150 = arith.mulf %145, %149 : vector<8x32xf32>
    %151 = tpu.concatenate %150, %120 in 1 : vector<8x32xf32>, vector<8x32xf32> -> vector<8x64xf32>
    %cst_56 = arith.constant dense<0.000000e+00> : vector<8x128xf32>
    %152 = tpu.matmul %151, %8, %cst_56 {dimension_numbers = #tpu.dot_dimension_numbers<[1], [0], [0], [1], [0, 0, 1, 1], [], []>} : vector<8x64xf32>, vector<64x128xf32>, vector<8x128xf32> -> vector<8x128xf32>
    %153 = arith.addf %152, %11 : vector<8x128xf32>
    %154 = math.tanh %153 : vector<8x128xf32>
    %155 = vector.extract_strided_slice %154 {offsets = [0, 0], sizes = [8, 32], strides = [1, 1]} : vector<8x128xf32> to vector<8x32xf32>
    %cst_57 = arith.constant 5.000000e-01 : f32
    %156 = vector.broadcast %cst_57 : f32 to vector<8x32xf32>
    %157 = arith.mulf %156, %155 : vector<8x32xf32>
    %cst_58 = arith.constant 5.000000e-01 : f32
    %158 = vector.broadcast %cst_58 : f32 to vector<8x32xf32>
    %159 = arith.addf %157, %158 : vector<8x32xf32>
    %160 = vector.extract_strided_slice %154 {offsets = [0, 32], sizes = [8, 32], strides = [1, 1]} : vector<8x128xf32> to vector<8x32xf32>
    %cst_59 = arith.constant 5.000000e-01 : f32
    %161 = vector.broadcast %cst_59 : f32 to vector<8x32xf32>
    %162 = arith.mulf %161, %160 : vector<8x32xf32>
    %cst_60 = arith.constant 5.000000e-01 : f32
    %163 = vector.broadcast %cst_60 : f32 to vector<8x32xf32>
    %164 = arith.addf %162, %163 : vector<8x32xf32>
    %165 = vector.extract_strided_slice %154 {offsets = [0, 64], sizes = [8, 32], strides = [1, 1]} : vector<8x128xf32> to vector<8x32xf32>
    %166 = vector.extract_strided_slice %154 {offsets = [0, 96], sizes = [8, 32], strides = [1, 1]} : vector<8x128xf32> to vector<8x32xf32>
    %cst_61 = arith.constant 5.000000e-01 : f32
    %167 = vector.broadcast %cst_61 : f32 to vector<8x32xf32>
    %168 = arith.mulf %167, %166 : vector<8x32xf32>
    %cst_62 = arith.constant 5.000000e-01 : f32
    %169 = vector.broadcast %cst_62 : f32 to vector<8x32xf32>
    %170 = arith.addf %168, %169 : vector<8x32xf32>
    %171 = arith.mulf %164, %118 : vector<8x32xf32>
    %172 = arith.mulf %159, %165 : vector<8x32xf32>
    %173 = arith.addf %171, %172 : vector<8x32xf32>
    %174 = math.tanh %173 : vector<8x32xf32>
    %175 = arith.mulf %170, %174 : vector<8x32xf32>
    %176 = arith.index_cast %124 : i32 to index
    %c0_63 = arith.constant 0 : index
    %177 = vector.load %arg16[%176, %c0_63] : memref<64x32xf32, #tpu.memory_space<vmem>>, vector<8x32xf32>
    tpu.vector_store %arg16[%176, %c0_63], %175 {strides = array<i32>} : memref<64x32xf32, #tpu.memory_space<vmem>>, vector<8x32xf32>,
    %c3_i32 = arith.constant 3 : i32
    %c8_i32_64 = arith.constant 8 : i32
    %178 = arith.muli %c3_i32, %c8_i32_64 : i32
    %179 = tpu.assume_multiple %178, 8 : i32
    %180 = arith.index_cast %179 : i32 to index
    %c0_65 = arith.constant 0 : index
    %181 = vector.load %arg15[%180, %c0_65] : memref<64x128xf32, #tpu.memory_space<vmem>>, vector<8x128xf32>
    %cst_66 = arith.constant dense<0.000000e+00> : vector<8x128xf32>
    %182 = tpu.matmul %150, %7, %cst_66 {dimension_numbers = #tpu.dot_dimension_numbers<[1], [0], [0], [1], [0, 0, 1, 1], [], []>} : vector<8x32xf32>, vector<32x128xf32>, vector<8x128xf32> -> vector<8x128xf32>
    %183 = arith.addf %181, %182 : vector<8x128xf32>
    %184 = math.tanh %183 : vector<8x128xf32>
    %185 = vector.extract_strided_slice %184 {offsets = [0, 0], sizes = [8, 32], strides = [1, 1]} : vector<8x128xf32> to vector<8x32xf32>
    %cst_67 = arith.constant 5.000000e-01 : f32
    %186 = vector.broadcast %cst_67 : f32 to vector<8x32xf32>
    %187 = arith.mulf %186, %185 : vector<8x32xf32>
    %cst_68 = arith.constant 5.000000e-01 : f32
    %188 = vector.broadcast %cst_68 : f32 to vector<8x32xf32>
    %189 = arith.addf %187, %188 : vector<8x32xf32>
    %190 = vector.extract_strided_slice %184 {offsets = [0, 32], sizes = [8, 32], strides = [1, 1]} : vector<8x128xf32> to vector<8x32xf32>
    %cst_69 = arith.constant 5.000000e-01 : f32
    %191 = vector.broadcast %cst_69 : f32 to vector<8x32xf32>
    %192 = arith.mulf %191, %190 : vector<8x32xf32>
    %cst_70 = arith.constant 5.000000e-01 : f32
    %193 = vector.broadcast %cst_70 : f32 to vector<8x32xf32>
    %194 = arith.addf %192, %193 : vector<8x32xf32>
    %195 = vector.extract_strided_slice %184 {offsets = [0, 64], sizes = [8, 32], strides = [1, 1]} : vector<8x128xf32> to vector<8x32xf32>
    %196 = vector.extract_strided_slice %184 {offsets = [0, 96], sizes = [8, 32], strides = [1, 1]} : vector<8x128xf32> to vector<8x32xf32>
    %cst_71 = arith.constant 5.000000e-01 : f32
    %197 = vector.broadcast %cst_71 : f32 to vector<8x32xf32>
    %198 = arith.mulf %197, %196 : vector<8x32xf32>
    %cst_72 = arith.constant 5.000000e-01 : f32
    %199 = vector.broadcast %cst_72 : f32 to vector<8x32xf32>
    %200 = arith.addf %198, %199 : vector<8x32xf32>
    %201 = arith.mulf %194, %148 : vector<8x32xf32>
    %202 = arith.mulf %189, %195 : vector<8x32xf32>
    %203 = arith.addf %201, %202 : vector<8x32xf32>
    %204 = math.tanh %203 : vector<8x32xf32>
    %205 = arith.mulf %200, %204 : vector<8x32xf32>
    %206 = tpu.concatenate %205, %175 in 1 : vector<8x32xf32>, vector<8x32xf32> -> vector<8x64xf32>
    %cst_73 = arith.constant dense<0.000000e+00> : vector<8x128xf32>
    %207 = tpu.matmul %206, %8, %cst_73 {dimension_numbers = #tpu.dot_dimension_numbers<[1], [0], [0], [1], [0, 0, 1, 1], [], []>} : vector<8x64xf32>, vector<64x128xf32>, vector<8x128xf32> -> vector<8x128xf32>
    %208 = arith.addf %207, %11 : vector<8x128xf32>
    %209 = math.tanh %208 : vector<8x128xf32>
    %210 = vector.extract_strided_slice %209 {offsets = [0, 0], sizes = [8, 32], strides = [1, 1]} : vector<8x128xf32> to vector<8x32xf32>
    %cst_74 = arith.constant 5.000000e-01 : f32
    %211 = vector.broadcast %cst_74 : f32 to vector<8x32xf32>
    %212 = arith.mulf %211, %210 : vector<8x32xf32>
    %cst_75 = arith.constant 5.000000e-01 : f32
    %213 = vector.broadcast %cst_75 : f32 to vector<8x32xf32>
    %214 = arith.addf %212, %213 : vector<8x32xf32>
    %215 = vector.extract_strided_slice %209 {offsets = [0, 32], sizes = [8, 32], strides = [1, 1]} : vector<8x128xf32> to vector<8x32xf32>
    %cst_76 = arith.constant 5.000000e-01 : f32
    %216 = vector.broadcast %cst_76 : f32 to vector<8x32xf32>
    %217 = arith.mulf %216, %215 : vector<8x32xf32>
    %cst_77 = arith.constant 5.000000e-01 : f32
    %218 = vector.broadcast %cst_77 : f32 to vector<8x32xf32>
    %219 = arith.addf %217, %218 : vector<8x32xf32>
    %220 = vector.extract_strided_slice %209 {offsets = [0, 64], sizes = [8, 32], strides = [1, 1]} : vector<8x128xf32> to vector<8x32xf32>
    %221 = vector.extract_strided_slice %209 {offsets = [0, 96], sizes = [8, 32], strides = [1, 1]} : vector<8x128xf32> to vector<8x32xf32>
    %cst_78 = arith.constant 5.000000e-01 : f32
    %222 = vector.broadcast %cst_78 : f32 to vector<8x32xf32>
    %223 = arith.mulf %222, %221 : vector<8x32xf32>
    %cst_79 = arith.constant 5.000000e-01 : f32
    %224 = vector.broadcast %cst_79 : f32 to vector<8x32xf32>
    %225 = arith.addf %223, %224 : vector<8x32xf32>
    %226 = arith.mulf %219, %173 : vector<8x32xf32>
    %227 = arith.mulf %214, %220 : vector<8x32xf32>
    %228 = arith.addf %226, %227 : vector<8x32xf32>
    %229 = math.tanh %228 : vector<8x32xf32>
    %230 = arith.mulf %225, %229 : vector<8x32xf32>
    %231 = arith.index_cast %179 : i32 to index
    %c0_80 = arith.constant 0 : index
    %232 = vector.load %arg16[%231, %c0_80] : memref<64x32xf32, #tpu.memory_space<vmem>>, vector<8x32xf32>
    tpu.vector_store %arg16[%231, %c0_80], %230 {strides = array<i32>} : memref<64x32xf32, #tpu.memory_space<vmem>>, vector<8x32xf32>,
    %c4_i32 = arith.constant 4 : i32
    %c8_i32_81 = arith.constant 8 : i32
    %233 = arith.muli %c4_i32, %c8_i32_81 : i32
    %234 = tpu.assume_multiple %233, 8 : i32
    %235 = arith.index_cast %234 : i32 to index
    %c0_82 = arith.constant 0 : index
    %236 = vector.load %arg15[%235, %c0_82] : memref<64x128xf32, #tpu.memory_space<vmem>>, vector<8x128xf32>
    %cst_83 = arith.constant dense<0.000000e+00> : vector<8x128xf32>
    %237 = tpu.matmul %205, %7, %cst_83 {dimension_numbers = #tpu.dot_dimension_numbers<[1], [0], [0], [1], [0, 0, 1, 1], [], []>} : vector<8x32xf32>, vector<32x128xf32>, vector<8x128xf32> -> vector<8x128xf32>
    %238 = arith.addf %236, %237 : vector<8x128xf32>
    %239 = math.tanh %238 : vector<8x128xf32>
    %240 = vector.extract_strided_slice %239 {offsets = [0, 0], sizes = [8, 32], strides = [1, 1]} : vector<8x128xf32> to vector<8x32xf32>
    %cst_84 = arith.constant 5.000000e-01 : f32
    %241 = vector.broadcast %cst_84 : f32 to vector<8x32xf32>
    %242 = arith.mulf %241, %240 : vector<8x32xf32>
    %cst_85 = arith.constant 5.000000e-01 : f32
    %243 = vector.broadcast %cst_85 : f32 to vector<8x32xf32>
    %244 = arith.addf %242, %243 : vector<8x32xf32>
    %245 = vector.extract_strided_slice %239 {offsets = [0, 32], sizes = [8, 32], strides = [1, 1]} : vector<8x128xf32> to vector<8x32xf32>
    %cst_86 = arith.constant 5.000000e-01 : f32
    %246 = vector.broadcast %cst_86 : f32 to vector<8x32xf32>
    %247 = arith.mulf %246, %245 : vector<8x32xf32>
    %cst_87 = arith.constant 5.000000e-01 : f32
    %248 = vector.broadcast %cst_87 : f32 to vector<8x32xf32>
    %249 = arith.addf %247, %248 : vector<8x32xf32>
    %250 = vector.extract_strided_slice %239 {offsets = [0, 64], sizes = [8, 32], strides = [1, 1]} : vector<8x128xf32> to vector<8x32xf32>
    %251 = vector.extract_strided_slice %239 {offsets = [0, 96], sizes = [8, 32], strides = [1, 1]} : vector<8x128xf32> to vector<8x32xf32>
    %cst_88 = arith.constant 5.000000e-01 : f32
    %252 = vector.broadcast %cst_88 : f32 to vector<8x32xf32>
    %253 = arith.mulf %252, %251 : vector<8x32xf32>
    %cst_89 = arith.constant 5.000000e-01 : f32
    %254 = vector.broadcast %cst_89 : f32 to vector<8x32xf32>
    %255 = arith.addf %253, %254 : vector<8x32xf32>
    %256 = arith.mulf %249, %203 : vector<8x32xf32>
    %257 = arith.mulf %244, %250 : vector<8x32xf32>
    %258 = arith.addf %256, %257 : vector<8x32xf32>
    %259 = math.tanh %258 : vector<8x32xf32>
    %260 = arith.mulf %255, %259 : vector<8x32xf32>
    %261 = tpu.concatenate %260, %230 in 1 : vector<8x32xf32>, vector<8x32xf32> -> vector<8x64xf32>
    %cst_90 = arith.constant dense<0.000000e+00> : vector<8x128xf32>
    %262 = tpu.matmul %261, %8, %cst_90 {dimension_numbers = #tpu.dot_dimension_numbers<[1], [0], [0], [1], [0, 0, 1, 1], [], []>} : vector<8x64xf32>, vector<64x128xf32>, vector<8x128xf32> -> vector<8x128xf32>
    %263 = arith.addf %262, %11 : vector<8x128xf32>
    %264 = math.tanh %263 : vector<8x128xf32>
    %265 = vector.extract_strided_slice %264 {offsets = [0, 0], sizes = [8, 32], strides = [1, 1]} : vector<8x128xf32> to vector<8x32xf32>
    %cst_91 = arith.constant 5.000000e-01 : f32
    %266 = vector.broadcast %cst_91 : f32 to vector<8x32xf32>
    %267 = arith.mulf %266, %265 : vector<8x32xf32>
    %cst_92 = arith.constant 5.000000e-01 : f32
    %268 = vector.broadcast %cst_92 : f32 to vector<8x32xf32>
    %269 = arith.addf %267, %268 : vector<8x32xf32>
    %270 = vector.extract_strided_slice %264 {offsets = [0, 32], sizes = [8, 32], strides = [1, 1]} : vector<8x128xf32> to vector<8x32xf32>
    %cst_93 = arith.constant 5.000000e-01 : f32
    %271 = vector.broadcast %cst_93 : f32 to vector<8x32xf32>
    %272 = arith.mulf %271, %270 : vector<8x32xf32>
    %cst_94 = arith.constant 5.000000e-01 : f32
    %273 = vector.broadcast %cst_94 : f32 to vector<8x32xf32>
    %274 = arith.addf %272, %273 : vector<8x32xf32>
    %275 = vector.extract_strided_slice %264 {offsets = [0, 64], sizes = [8, 32], strides = [1, 1]} : vector<8x128xf32> to vector<8x32xf32>
    %276 = vector.extract_strided_slice %264 {offsets = [0, 96], sizes = [8, 32], strides = [1, 1]} : vector<8x128xf32> to vector<8x32xf32>
    %cst_95 = arith.constant 5.000000e-01 : f32
    %277 = vector.broadcast %cst_95 : f32 to vector<8x32xf32>
    %278 = arith.mulf %277, %276 : vector<8x32xf32>
    %cst_96 = arith.constant 5.000000e-01 : f32
    %279 = vector.broadcast %cst_96 : f32 to vector<8x32xf32>
    %280 = arith.addf %278, %279 : vector<8x32xf32>
    %281 = arith.mulf %274, %228 : vector<8x32xf32>
    %282 = arith.mulf %269, %275 : vector<8x32xf32>
    %283 = arith.addf %281, %282 : vector<8x32xf32>
    %284 = math.tanh %283 : vector<8x32xf32>
    %285 = arith.mulf %280, %284 : vector<8x32xf32>
    %286 = arith.index_cast %234 : i32 to index
    %c0_97 = arith.constant 0 : index
    %287 = vector.load %arg16[%286, %c0_97] : memref<64x32xf32, #tpu.memory_space<vmem>>, vector<8x32xf32>
    tpu.vector_store %arg16[%286, %c0_97], %285 {strides = array<i32>} : memref<64x32xf32, #tpu.memory_space<vmem>>, vector<8x32xf32>,
    %c5_i32 = arith.constant 5 : i32
    %c8_i32_98 = arith.constant 8 : i32
    %288 = arith.muli %c5_i32, %c8_i32_98 : i32
    %289 = tpu.assume_multiple %288, 8 : i32
    %290 = arith.index_cast %289 : i32 to index
    %c0_99 = arith.constant 0 : index
    %291 = vector.load %arg15[%290, %c0_99] : memref<64x128xf32, #tpu.memory_space<vmem>>, vector<8x128xf32>
    %cst_100 = arith.constant dense<0.000000e+00> : vector<8x128xf32>
    %292 = tpu.matmul %260, %7, %cst_100 {dimension_numbers = #tpu.dot_dimension_numbers<[1], [0], [0], [1], [0, 0, 1, 1], [], []>} : vector<8x32xf32>, vector<32x128xf32>, vector<8x128xf32> -> vector<8x128xf32>
    %293 = arith.addf %291, %292 : vector<8x128xf32>
    %294 = math.tanh %293 : vector<8x128xf32>
    %295 = vector.extract_strided_slice %294 {offsets = [0, 0], sizes = [8, 32], strides = [1, 1]} : vector<8x128xf32> to vector<8x32xf32>
    %cst_101 = arith.constant 5.000000e-01 : f32
    %296 = vector.broadcast %cst_101 : f32 to vector<8x32xf32>
    %297 = arith.mulf %296, %295 : vector<8x32xf32>
    %cst_102 = arith.constant 5.000000e-01 : f32
    %298 = vector.broadcast %cst_102 : f32 to vector<8x32xf32>
    %299 = arith.addf %297, %298 : vector<8x32xf32>
    %300 = vector.extract_strided_slice %294 {offsets = [0, 32], sizes = [8, 32], strides = [1, 1]} : vector<8x128xf32> to vector<8x32xf32>
    %cst_103 = arith.constant 5.000000e-01 : f32
    %301 = vector.broadcast %cst_103 : f32 to vector<8x32xf32>
    %302 = arith.mulf %301, %300 : vector<8x32xf32>
    %cst_104 = arith.constant 5.000000e-01 : f32
    %303 = vector.broadcast %cst_104 : f32 to vector<8x32xf32>
    %304 = arith.addf %302, %303 : vector<8x32xf32>
    %305 = vector.extract_strided_slice %294 {offsets = [0, 64], sizes = [8, 32], strides = [1, 1]} : vector<8x128xf32> to vector<8x32xf32>
    %306 = vector.extract_strided_slice %294 {offsets = [0, 96], sizes = [8, 32], strides = [1, 1]} : vector<8x128xf32> to vector<8x32xf32>
    %cst_105 = arith.constant 5.000000e-01 : f32
    %307 = vector.broadcast %cst_105 : f32 to vector<8x32xf32>
    %308 = arith.mulf %307, %306 : vector<8x32xf32>
    %cst_106 = arith.constant 5.000000e-01 : f32
    %309 = vector.broadcast %cst_106 : f32 to vector<8x32xf32>
    %310 = arith.addf %308, %309 : vector<8x32xf32>
    %311 = arith.mulf %304, %258 : vector<8x32xf32>
    %312 = arith.mulf %299, %305 : vector<8x32xf32>
    %313 = arith.addf %311, %312 : vector<8x32xf32>
    %314 = math.tanh %313 : vector<8x32xf32>
    %315 = arith.mulf %310, %314 : vector<8x32xf32>
    %316 = tpu.concatenate %315, %285 in 1 : vector<8x32xf32>, vector<8x32xf32> -> vector<8x64xf32>
    %cst_107 = arith.constant dense<0.000000e+00> : vector<8x128xf32>
    %317 = tpu.matmul %316, %8, %cst_107 {dimension_numbers = #tpu.dot_dimension_numbers<[1], [0], [0], [1], [0, 0, 1, 1], [], []>} : vector<8x64xf32>, vector<64x128xf32>, vector<8x128xf32> -> vector<8x128xf32>
    %318 = arith.addf %317, %11 : vector<8x128xf32>
    %319 = math.tanh %318 : vector<8x128xf32>
    %320 = vector.extract_strided_slice %319 {offsets = [0, 0], sizes = [8, 32], strides = [1, 1]} : vector<8x128xf32> to vector<8x32xf32>
    %cst_108 = arith.constant 5.000000e-01 : f32
    %321 = vector.broadcast %cst_108 : f32 to vector<8x32xf32>
    %322 = arith.mulf %321, %320 : vector<8x32xf32>
    %cst_109 = arith.constant 5.000000e-01 : f32
    %323 = vector.broadcast %cst_109 : f32 to vector<8x32xf32>
    %324 = arith.addf %322, %323 : vector<8x32xf32>
    %325 = vector.extract_strided_slice %319 {offsets = [0, 32], sizes = [8, 32], strides = [1, 1]} : vector<8x128xf32> to vector<8x32xf32>
    %cst_110 = arith.constant 5.000000e-01 : f32
    %326 = vector.broadcast %cst_110 : f32 to vector<8x32xf32>
    %327 = arith.mulf %326, %325 : vector<8x32xf32>
    %cst_111 = arith.constant 5.000000e-01 : f32
    %328 = vector.broadcast %cst_111 : f32 to vector<8x32xf32>
    %329 = arith.addf %327, %328 : vector<8x32xf32>
    %330 = vector.extract_strided_slice %319 {offsets = [0, 64], sizes = [8, 32], strides = [1, 1]} : vector<8x128xf32> to vector<8x32xf32>
    %331 = vector.extract_strided_slice %319 {offsets = [0, 96], sizes = [8, 32], strides = [1, 1]} : vector<8x128xf32> to vector<8x32xf32>
    %cst_112 = arith.constant 5.000000e-01 : f32
    %332 = vector.broadcast %cst_112 : f32 to vector<8x32xf32>
    %333 = arith.mulf %332, %331 : vector<8x32xf32>
    %cst_113 = arith.constant 5.000000e-01 : f32
    %334 = vector.broadcast %cst_113 : f32 to vector<8x32xf32>
    %335 = arith.addf %333, %334 : vector<8x32xf32>
    %336 = arith.mulf %329, %283 : vector<8x32xf32>
    %337 = arith.mulf %324, %330 : vector<8x32xf32>
    %338 = arith.addf %336, %337 : vector<8x32xf32>
    %339 = math.tanh %338 : vector<8x32xf32>
    %340 = arith.mulf %335, %339 : vector<8x32xf32>
    %341 = arith.index_cast %289 : i32 to index
    %c0_114 = arith.constant 0 : index
    %342 = vector.load %arg16[%341, %c0_114] : memref<64x32xf32, #tpu.memory_space<vmem>>, vector<8x32xf32>
    tpu.vector_store %arg16[%341, %c0_114], %340 {strides = array<i32>} : memref<64x32xf32, #tpu.memory_space<vmem>>, vector<8x32xf32>,
    %c6_i32 = arith.constant 6 : i32
    %c8_i32_115 = arith.constant 8 : i32
    %343 = arith.muli %c6_i32, %c8_i32_115 : i32
    %344 = tpu.assume_multiple %343, 8 : i32
    %345 = arith.index_cast %344 : i32 to index
    %c0_116 = arith.constant 0 : index
    %346 = vector.load %arg15[%345, %c0_116] : memref<64x128xf32, #tpu.memory_space<vmem>>, vector<8x128xf32>
    %cst_117 = arith.constant dense<0.000000e+00> : vector<8x128xf32>
    %347 = tpu.matmul %315, %7, %cst_117 {dimension_numbers = #tpu.dot_dimension_numbers<[1], [0], [0], [1], [0, 0, 1, 1], [], []>} : vector<8x32xf32>, vector<32x128xf32>, vector<8x128xf32> -> vector<8x128xf32>
    %348 = arith.addf %346, %347 : vector<8x128xf32>
    %349 = math.tanh %348 : vector<8x128xf32>
    %350 = vector.extract_strided_slice %349 {offsets = [0, 0], sizes = [8, 32], strides = [1, 1]} : vector<8x128xf32> to vector<8x32xf32>
    %cst_118 = arith.constant 5.000000e-01 : f32
    %351 = vector.broadcast %cst_118 : f32 to vector<8x32xf32>
    %352 = arith.mulf %351, %350 : vector<8x32xf32>
    %cst_119 = arith.constant 5.000000e-01 : f32
    %353 = vector.broadcast %cst_119 : f32 to vector<8x32xf32>
    %354 = arith.addf %352, %353 : vector<8x32xf32>
    %355 = vector.extract_strided_slice %349 {offsets = [0, 32], sizes = [8, 32], strides = [1, 1]} : vector<8x128xf32> to vector<8x32xf32>
    %cst_120 = arith.constant 5.000000e-01 : f32
    %356 = vector.broadcast %cst_120 : f32 to vector<8x32xf32>
    %357 = arith.mulf %356, %355 : vector<8x32xf32>
    %cst_121 = arith.constant 5.000000e-01 : f32
    %358 = vector.broadcast %cst_121 : f32 to vector<8x32xf32>
    %359 = arith.addf %357, %358 : vector<8x32xf32>
    %360 = vector.extract_strided_slice %349 {offsets = [0, 64], sizes = [8, 32], strides = [1, 1]} : vector<8x128xf32> to vector<8x32xf32>
    %361 = vector.extract_strided_slice %349 {offsets = [0, 96], sizes = [8, 32], strides = [1, 1]} : vector<8x128xf32> to vector<8x32xf32>
    %cst_122 = arith.constant 5.000000e-01 : f32
    %362 = vector.broadcast %cst_122 : f32 to vector<8x32xf32>
    %363 = arith.mulf %362, %361 : vector<8x32xf32>
    %cst_123 = arith.constant 5.000000e-01 : f32
    %364 = vector.broadcast %cst_123 : f32 to vector<8x32xf32>
    %365 = arith.addf %363, %364 : vector<8x32xf32>
    %366 = arith.mulf %359, %313 : vector<8x32xf32>
    %367 = arith.mulf %354, %360 : vector<8x32xf32>
    %368 = arith.addf %366, %367 : vector<8x32xf32>
    %369 = math.tanh %368 : vector<8x32xf32>
    %370 = arith.mulf %365, %369 : vector<8x32xf32>
    %371 = tpu.concatenate %370, %340 in 1 : vector<8x32xf32>, vector<8x32xf32> -> vector<8x64xf32>
    %cst_124 = arith.constant dense<0.000000e+00> : vector<8x128xf32>
    %372 = tpu.matmul %371, %8, %cst_124 {dimension_numbers = #tpu.dot_dimension_numbers<[1], [0], [0], [1], [0, 0, 1, 1], [], []>} : vector<8x64xf32>, vector<64x128xf32>, vector<8x128xf32> -> vector<8x128xf32>
    %373 = arith.addf %372, %11 : vector<8x128xf32>
    %374 = math.tanh %373 : vector<8x128xf32>
    %375 = vector.extract_strided_slice %374 {offsets = [0, 0], sizes = [8, 32], strides = [1, 1]} : vector<8x128xf32> to vector<8x32xf32>
    %cst_125 = arith.constant 5.000000e-01 : f32
    %376 = vector.broadcast %cst_125 : f32 to vector<8x32xf32>
    %377 = arith.mulf %376, %375 : vector<8x32xf32>
    %cst_126 = arith.constant 5.000000e-01 : f32
    %378 = vector.broadcast %cst_126 : f32 to vector<8x32xf32>
    %379 = arith.addf %377, %378 : vector<8x32xf32>
    %380 = vector.extract_strided_slice %374 {offsets = [0, 32], sizes = [8, 32], strides = [1, 1]} : vector<8x128xf32> to vector<8x32xf32>
    %cst_127 = arith.constant 5.000000e-01 : f32
    %381 = vector.broadcast %cst_127 : f32 to vector<8x32xf32>
    %382 = arith.mulf %381, %380 : vector<8x32xf32>
    %cst_128 = arith.constant 5.000000e-01 : f32
    %383 = vector.broadcast %cst_128 : f32 to vector<8x32xf32>
    %384 = arith.addf %382, %383 : vector<8x32xf32>
    %385 = vector.extract_strided_slice %374 {offsets = [0, 64], sizes = [8, 32], strides = [1, 1]} : vector<8x128xf32> to vector<8x32xf32>
    %386 = vector.extract_strided_slice %374 {offsets = [0, 96], sizes = [8, 32], strides = [1, 1]} : vector<8x128xf32> to vector<8x32xf32>
    %cst_129 = arith.constant 5.000000e-01 : f32
    %387 = vector.broadcast %cst_129 : f32 to vector<8x32xf32>
    %388 = arith.mulf %387, %386 : vector<8x32xf32>
    %cst_130 = arith.constant 5.000000e-01 : f32
    %389 = vector.broadcast %cst_130 : f32 to vector<8x32xf32>
    %390 = arith.addf %388, %389 : vector<8x32xf32>
    %391 = arith.mulf %384, %338 : vector<8x32xf32>
    %392 = arith.mulf %379, %385 : vector<8x32xf32>
    %393 = arith.addf %391, %392 : vector<8x32xf32>
    %394 = math.tanh %393 : vector<8x32xf32>
    %395 = arith.mulf %390, %394 : vector<8x32xf32>
    %396 = arith.index_cast %344 : i32 to index
    %c0_131 = arith.constant 0 : index
    %397 = vector.load %arg16[%396, %c0_131] : memref<64x32xf32, #tpu.memory_space<vmem>>, vector<8x32xf32>
    tpu.vector_store %arg16[%396, %c0_131], %395 {strides = array<i32>} : memref<64x32xf32, #tpu.memory_space<vmem>>, vector<8x32xf32>,
    %c7_i32 = arith.constant 7 : i32
    %c8_i32_132 = arith.constant 8 : i32
    %398 = arith.muli %c7_i32, %c8_i32_132 : i32
    %399 = tpu.assume_multiple %398, 8 : i32
    %400 = arith.index_cast %399 : i32 to index
    %c0_133 = arith.constant 0 : index
    %401 = vector.load %arg15[%400, %c0_133] : memref<64x128xf32, #tpu.memory_space<vmem>>, vector<8x128xf32>
    %cst_134 = arith.constant dense<0.000000e+00> : vector<8x128xf32>
    %402 = tpu.matmul %370, %7, %cst_134 {dimension_numbers = #tpu.dot_dimension_numbers<[1], [0], [0], [1], [0, 0, 1, 1], [], []>} : vector<8x32xf32>, vector<32x128xf32>, vector<8x128xf32> -> vector<8x128xf32>
    %403 = arith.addf %401, %402 : vector<8x128xf32>
    %404 = math.tanh %403 : vector<8x128xf32>
    %405 = vector.extract_strided_slice %404 {offsets = [0, 0], sizes = [8, 32], strides = [1, 1]} : vector<8x128xf32> to vector<8x32xf32>
    %cst_135 = arith.constant 5.000000e-01 : f32
    %406 = vector.broadcast %cst_135 : f32 to vector<8x32xf32>
    %407 = arith.mulf %406, %405 : vector<8x32xf32>
    %cst_136 = arith.constant 5.000000e-01 : f32
    %408 = vector.broadcast %cst_136 : f32 to vector<8x32xf32>
    %409 = arith.addf %407, %408 : vector<8x32xf32>
    %410 = vector.extract_strided_slice %404 {offsets = [0, 32], sizes = [8, 32], strides = [1, 1]} : vector<8x128xf32> to vector<8x32xf32>
    %cst_137 = arith.constant 5.000000e-01 : f32
    %411 = vector.broadcast %cst_137 : f32 to vector<8x32xf32>
    %412 = arith.mulf %411, %410 : vector<8x32xf32>
    %cst_138 = arith.constant 5.000000e-01 : f32
    %413 = vector.broadcast %cst_138 : f32 to vector<8x32xf32>
    %414 = arith.addf %412, %413 : vector<8x32xf32>
    %415 = vector.extract_strided_slice %404 {offsets = [0, 64], sizes = [8, 32], strides = [1, 1]} : vector<8x128xf32> to vector<8x32xf32>
    %416 = vector.extract_strided_slice %404 {offsets = [0, 96], sizes = [8, 32], strides = [1, 1]} : vector<8x128xf32> to vector<8x32xf32>
    %cst_139 = arith.constant 5.000000e-01 : f32
    %417 = vector.broadcast %cst_139 : f32 to vector<8x32xf32>
    %418 = arith.mulf %417, %416 : vector<8x32xf32>
    %cst_140 = arith.constant 5.000000e-01 : f32
    %419 = vector.broadcast %cst_140 : f32 to vector<8x32xf32>
    %420 = arith.addf %418, %419 : vector<8x32xf32>
    %421 = arith.mulf %414, %368 : vector<8x32xf32>
    %422 = arith.mulf %409, %415 : vector<8x32xf32>
    %423 = arith.addf %421, %422 : vector<8x32xf32>
    %424 = math.tanh %423 : vector<8x32xf32>
    %425 = arith.mulf %420, %424 : vector<8x32xf32>
    %426 = tpu.concatenate %425, %395 in 1 : vector<8x32xf32>, vector<8x32xf32> -> vector<8x64xf32>
    %cst_141 = arith.constant dense<0.000000e+00> : vector<8x128xf32>
    %427 = tpu.matmul %426, %8, %cst_141 {dimension_numbers = #tpu.dot_dimension_numbers<[1], [0], [0], [1], [0, 0, 1, 1], [], []>} : vector<8x64xf32>, vector<64x128xf32>, vector<8x128xf32> -> vector<8x128xf32>
    %428 = arith.addf %427, %11 : vector<8x128xf32>
    %429 = math.tanh %428 : vector<8x128xf32>
    %430 = vector.extract_strided_slice %429 {offsets = [0, 0], sizes = [8, 32], strides = [1, 1]} : vector<8x128xf32> to vector<8x32xf32>
    %cst_142 = arith.constant 5.000000e-01 : f32
    %431 = vector.broadcast %cst_142 : f32 to vector<8x32xf32>
    %432 = arith.mulf %431, %430 : vector<8x32xf32>
    %cst_143 = arith.constant 5.000000e-01 : f32
    %433 = vector.broadcast %cst_143 : f32 to vector<8x32xf32>
    %434 = arith.addf %432, %433 : vector<8x32xf32>
    %435 = vector.extract_strided_slice %429 {offsets = [0, 32], sizes = [8, 32], strides = [1, 1]} : vector<8x128xf32> to vector<8x32xf32>
    %cst_144 = arith.constant 5.000000e-01 : f32
    %436 = vector.broadcast %cst_144 : f32 to vector<8x32xf32>
    %437 = arith.mulf %436, %435 : vector<8x32xf32>
    %cst_145 = arith.constant 5.000000e-01 : f32
    %438 = vector.broadcast %cst_145 : f32 to vector<8x32xf32>
    %439 = arith.addf %437, %438 : vector<8x32xf32>
    %440 = vector.extract_strided_slice %429 {offsets = [0, 64], sizes = [8, 32], strides = [1, 1]} : vector<8x128xf32> to vector<8x32xf32>
    %441 = vector.extract_strided_slice %429 {offsets = [0, 96], sizes = [8, 32], strides = [1, 1]} : vector<8x128xf32> to vector<8x32xf32>
    %cst_146 = arith.constant 5.000000e-01 : f32
    %442 = vector.broadcast %cst_146 : f32 to vector<8x32xf32>
    %443 = arith.mulf %442, %441 : vector<8x32xf32>
    %cst_147 = arith.constant 5.000000e-01 : f32
    %444 = vector.broadcast %cst_147 : f32 to vector<8x32xf32>
    %445 = arith.addf %443, %444 : vector<8x32xf32>
    %446 = arith.mulf %439, %393 : vector<8x32xf32>
    %447 = arith.mulf %434, %440 : vector<8x32xf32>
    %448 = arith.addf %446, %447 : vector<8x32xf32>
    %449 = math.tanh %448 : vector<8x32xf32>
    %450 = arith.mulf %445, %449 : vector<8x32xf32>
    %451 = arith.index_cast %399 : i32 to index
    %c0_148 = arith.constant 0 : index
    %452 = vector.load %arg16[%451, %c0_148] : memref<64x32xf32, #tpu.memory_space<vmem>>, vector<8x32xf32>
    tpu.vector_store %arg16[%451, %c0_148], %450 {strides = array<i32>} : memref<64x32xf32, #tpu.memory_space<vmem>>, vector<8x32xf32>,
    %c8_i32_149 = arith.constant 8 : i32
    %c0_150 = arith.constant 0 : index
    %c0_151 = arith.constant 0 : index
    %453 = vector.load %arg16[%c0_150, %c0_151] : memref<64x32xf32, #tpu.memory_space<vmem>>, vector<64x32xf32>
    %c0_152 = arith.constant 0 : index
    %c0_153 = arith.constant 0 : index
    %454 = vector.load %arg6[%c0_152, %c0_153] : memref<32x32xf32, #tpu.memory_space<vmem>>, vector<32x32xf32>
    %cst_154 = arith.constant dense<0.000000e+00> : vector<64x32xf32>
    %455 = tpu.matmul %453, %454, %cst_154 {dimension_numbers = #tpu.dot_dimension_numbers<[1], [0], [0], [1], [0, 0, 1, 1], [], []>} : vector<64x32xf32>, vector<32x32xf32>, vector<64x32xf32> -> vector<64x32xf32>
    %c0_155 = arith.constant 0 : index
    %c0_156 = arith.constant 0 : index
    %456 = vector.load %arg7[%c0_155, %c0_156] : memref<1x32xf32, #tpu.memory_space<vmem>>, vector<1x32xf32>
    %457 = vector.broadcast %456 : vector<1x32xf32> to vector<64x32xf32>
    %458 = arith.addf %455, %457 : vector<64x32xf32>
    %459 = math.tanh %458 : vector<64x32xf32>
    %c0_157 = arith.constant 0 : index
    %c0_158 = arith.constant 0 : index
    %460 = vector.load %arg8[%c0_157, %c0_158] : memref<1x32xf32, #tpu.memory_space<vmem>>, vector<1x32xf32>
    %461 = vector.broadcast %460 : vector<1x32xf32> to vector<64x32xf32>
    %462 = arith.mulf %459, %461 : vector<64x32xf32>
    %cst_159 = arith.constant dense<0.000000e+00> : vector<64xf32>
    %463 = vector.multi_reduction <add>, %462, %cst_159 [1] : vector<64x32xf32> to vector<64xf32>
    %464 = vector.shape_cast %463 : vector<64xf32> to vector<64x1xf32>
    %c0_160 = arith.constant 0 : index
    %c0_161 = arith.constant 0 : index
    %465 = vector.load %arg9[%c0_160, %c0_161] : memref<1x1xf32, #tpu.memory_space<vmem>>, vector<1x1xf32>
    %466 = vector.broadcast %465 : vector<1x1xf32> to vector<64x1xf32>
    %467 = arith.addf %464, %466 : vector<64x1xf32>
    %468 = vector.shape_cast %467 : vector<64x1xf32> to vector<8x8x1xf32>
    %cst_162 = arith.constant dense<0xFF800000> : vector<8x1xf32>
    %469 = vector.multi_reduction <maximumf>, %468, %cst_162 [0] : vector<8x8x1xf32> to vector<8x1xf32>
    %470 = vector.shape_cast %469 : vector<8x1xf32> to vector<1x8x1xf32>
    %471 = vector.broadcast %470 : vector<1x8x1xf32> to vector<8x8x1xf32>
    %472 = arith.subf %468, %471 : vector<8x8x1xf32>
    %473 = math.exp %472 : vector<8x8x1xf32>
    %cst_163 = arith.constant dense<0.000000e+00> : vector<8x1xf32>
    %474 = vector.multi_reduction <add>, %473, %cst_163 [0] : vector<8x8x1xf32> to vector<8x1xf32>
    %475 = vector.shape_cast %474 : vector<8x1xf32> to vector<1x8x1xf32>
    %476 = tpu.reciprocal %475 {approx = true} : vector<1x8x1xf32> -> vector<1x8x1xf32>
    %477 = vector.broadcast %476 : vector<1x8x1xf32> to vector<8x8x1xf32>
    %478 = arith.mulf %473, %477 : vector<8x8x1xf32>
    %479 = vector.shape_cast %453 : vector<64x32xf32> to vector<8x8x32xf32>
    %480 = vector.broadcast %478 : vector<8x8x1xf32> to vector<8x8x32xf32>
    %481 = arith.mulf %480, %479 : vector<8x8x32xf32>
    %cst_164 = arith.constant dense<0.000000e+00> : vector<8x32xf32>
    %482 = vector.multi_reduction <add>, %481, %cst_164 [0] : vector<8x8x32xf32> to vector<8x32xf32>
    %c0_165 = arith.constant 0 : index
    %c0_166 = arith.constant 0 : index
    %483 = vector.load %arg10[%c0_165, %c0_166] : memref<32x16xf32, #tpu.memory_space<vmem>>, vector<32x16xf32>
    %cst_167 = arith.constant dense<0.000000e+00> : vector<8x16xf32>
    %484 = tpu.matmul %482, %483, %cst_167 {dimension_numbers = #tpu.dot_dimension_numbers<[1], [0], [0], [1], [0, 0, 1, 1], [], []>} : vector<8x32xf32>, vector<32x16xf32>, vector<8x16xf32> -> vector<8x16xf32>
    %c0_168 = arith.constant 0 : index
    %c0_169 = arith.constant 0 : index
    %485 = vector.load %arg11[%c0_168, %c0_169] : memref<1x16xf32, #tpu.memory_space<vmem>>, vector<1x16xf32>
    %486 = vector.broadcast %485 : vector<1x16xf32> to vector<8x16xf32>
    %487 = arith.addf %484, %486 : vector<8x16xf32>
    %cst_170 = arith.constant 0.000000e+00 : f32
    %488 = vector.broadcast %cst_170 : f32 to vector<8x16xf32>
    %489 = arith.maximumf %487, %488 : vector<8x16xf32>
    %c0_171 = arith.constant 0 : index
    %c0_172 = arith.constant 0 : index
    %490 = vector.load %arg12[%c0_171, %c0_172] : memref<16x1xf32, #tpu.memory_space<vmem>>, vector<16x1xf32>
    %cst_173 = arith.constant dense<0.000000e+00> : vector<8x1xf32>
    %491 = tpu.matmul %489, %490, %cst_173 {dimension_numbers = #tpu.dot_dimension_numbers<[1], [0], [0], [1], [0, 0, 1, 1], [], []>} : vector<8x16xf32>, vector<16x1xf32>, vector<8x1xf32> -> vector<8x1xf32>
    %c0_174 = arith.constant 0 : index
    %c0_175 = arith.constant 0 : index
    %492 = vector.load %arg13[%c0_174, %c0_175] : memref<1x1xf32, #tpu.memory_space<vmem>>, vector<1x1xf32>
    %493 = vector.broadcast %492 : vector<1x1xf32> to vector<8x1xf32>
    %494 = arith.addf %491, %493 : vector<8x1xf32>
    %495 = arith.negf %494 : vector<8x1xf32>
    %496 = math.exp %495 : vector<8x1xf32>
    %cst_176 = arith.constant 1.000000e+00 : f32
    %497 = vector.broadcast %cst_176 : f32 to vector<8x1xf32>
    %498 = arith.addf %497, %496 : vector<8x1xf32>
    %499 = arith.divf %497, %498 : vector<8x1xf32>
    %c0_177 = arith.constant 0 : index
    %c0_178 = arith.constant 0 : index
    %500 = vector.load %arg14[%c0_177, %c0_178] : memref<8x1xf32, #tpu.memory_space<vmem>>, vector<8x1xf32>
    tpu.vector_store %arg14[%c0_177, %c0_178], %499 {strides = array<i32>} : memref<8x1xf32, #tpu.memory_space<vmem>>, vector<8x1xf32>,
    return
  }
}

</mosaic_0001>

<bundles_post_ra>
// kernel: original_lstm_forward.1
= control target key start
LH: loop header
LB: loop body
LE: loop exit
PB: predicated region body
PF: predicated region fallthrough
CT: control target
= control target key end

     0   :  { %vm93_vm0 = vcmask 1040384   ;;  %vm68_vm1 = vcmask 72704   ;;  %v3115_v0 = vmov 0.0|0.0   ;;  %vm3116_vm2 = vmmov 1   ;;  %s3119_s29 = smov 64   ;;  %s3120_s30 = smov 32   ;;  %s3718_s1 = inlined_call_operand.vmem [shape: f32[9,128], index: 1, kind: input, shape index: {}]   ;;  %s3719_s2 = inlined_call_operand.vmem [shape: f32[32,128], index: 2, kind: input, shape index: {}]   ;;  %s3720_s0 = inlined_call_operand.vmem [shape: f32[64,9], index: 0, kind: input, shape index: {}]   ;;  %s3721_s3 = inlined_call_operand.vmem [shape: f32[1,128], index: 3, kind: input, shape index: {}]   ;;  %s3722_s4 = inlined_call_operand.vmem [shape: f32[64,128], index: 4, kind: input, shape index: {}]   ;;  %s3723_s5 = inlined_call_operand.vmem [shape: f32[1,128], index: 5, kind: input, shape index: {}]   ;;  %s3724_s6 = inlined_call_operand.vmem [shape: f32[32,32], index: 6, kind: input, shape index: {}]   ;;  %s3725_s7 = inlined_call_operand.vmem [shape: f32[1,32], index: 7, kind: input, shape index: {}]   ;;  %s3726_s9 = inlined_call_operand.<no memory space> [shape: f32[1,1], index: 9, kind: input, shape index: {}]   ;;  %s3727_s8 = inlined_call_operand.vmem [shape: f32[1,32], index: 8, kind: input, shape index: {}]   ;;  %s3728_s10 = inlined_call_operand.vmem [shape: f32[32,16], index: 10, kind: input, shape index: {}]   ;;  %s3729_s12 = inlined_call_operand.vmem [shape: f32[16,1], index: 12, kind: input, shape index: {}]   ;;  %s3730_s13 = inlined_call_operand.<no memory space> [shape: f32[1,1], index: 13, kind: input, shape index: {}]   ;;  %s3731_s11 = inlined_call_operand.vmem [shape: f32[1,16], index: 11, kind: input, shape index: {}]   ;;  %s3732_s14 = inlined_call_operand.vmem [shape: f32[8,1], index: 14, kind: output, shape index: {}]  }
   0x1   :  { %2843 = vmatprep.subr.bf16.mxu1 %v3115_v0  ;;  %v59_v1 = vld [vmem:[%s3718_s1] sm:$0xff]  ;;  %v60_v2 = vld [vmem:[%s3718_s1 + $0x8] sm:$0x1]  ;;  %vm2838_vm3 = vmpackc.low %vm93_vm0, %vm3116_vm2  ;;  %vm3117_vm4 = vmmov 0   ;;  %v3118_v7 = vmov 0.0   ;;  %vm230_vm5 = vcmask 261120  }
   0x2   :  { %v2837_v3 = vpack.c.bf16 %v60_v2, %v59_v1  ;;  %v210_v4 = vld [vmem:[%s3719_s2] sm:$0xff]  ;;  %v211_v5 = vld [vmem:[%s3719_s2 + $0x8] sm:$0xff]  ;;  %2567 = vmatprep.mubr.msk.f32.mxu1 %vm3117_vm4, %v3118_v7  ;;  %v212_v9 = vld [vmem:[%s3719_s2 + $0x10] sm:$0xff]  ;;  %vm330_vm6 = vcmask 523264   ;;  %vm2053_vm7 = vcmask 7168   ;;  %vm2274_vm8 = vcmask 130048  }
   0x3   :  { %v51_v6 = vld [vmem:[%s3720_s0] sm:$0xff]  ;;  %v3215_v8 = vpack.c.bf16 %v211_v5, %v210_v4  ;;  %v213_v10 = vld [vmem:[%s3719_s2 + $0x18] sm:$0xff]  ;;  %v52_v11 = vld [vmem:[%s3720_s0 + $0x8] sm:$0xff] }
   0x4   :  { %2547 = vmatprep.mubr.msk.f32.mxu0 %vm68_vm1, %v51_v6  ;;  %2839 = vmatprep.subr.msk.bf16.mxu0 %vm2838_vm3, %v2837_v3  ;;  %v3228_v12 = vpack.c.bf16 %v213_v10, %v212_v9  ;;  %v3245_v13 = vld [vmem:[%s3721_s3] ss:$0 sm:$0xff]  ;;  %v53_v28 = vld [vmem:[%s3720_s0 + $0x10] sm:$0xff]  ;;  %v54_v29 = vld [vmem:[%s3720_s0 + $0x18] sm:$0xff] }
   0x5   :  { %2845 = vmatpush3.bf16.msra.mxu1 %v3215_v8  ;;  %2842 = vmatpush3.bf16.msk.msra.mxu0 %vm2838_vm3, %v2837_v3  ;;  %v55_v30 = vld [vmem:[%s3720_s0 + $0x20] sm:$0xff]  ;;  %v215_v32 = vld [vmem:[%s3722_s4 + $0x8] sm:$0xff]  ;;  %v216_v33 = vld [vmem:[%s3722_s4 + $0x10] sm:$0xff] }
   0x6   :  { %2846 = vmatprep.subr.bf16.mxu1 %v3115_v0  ;;  %2849 = vmatprep.subr.bf16.mxu0 %v3115_v0  ;;  %v214_v31 = vld [vmem:[%s3722_s4] sm:$0xff]  ;;  %v217_v35 = vld [vmem:[%s3722_s4 + $0x18] sm:$0xff]  ;;  %v56_v36 = vld [vmem:[%s3720_s0 + $0x28] sm:$0xff] }
   0x7   :  { %v3274_v34 = vpack.c.bf16 %v215_v32, %v214_v31  ;;  %v3285_v37 = vpack.c.bf16 %v217_v35, %v216_v33  ;;  %v57_v38 = vld [vmem:[%s3720_s0 + $0x30] sm:$0xff]  ;;  %v218_v39 = vld [vmem:[%s3722_s4 + $0x20] sm:$0xff]  ;;  %v219_v40 = vld [vmem:[%s3722_s4 + $0x28] sm:$0xff] }
   0x8   :  { %2548 = vmatmul.mubr.msk.f32.vlgmr.msra.gmra.mrb[0].mxu0 %vm68_vm1, %v52_v11  ;;  %v58_v41 = vld [vmem:[%s3720_s0 + $0x38] sm:$0xff]  ;;  %v3303_v42 = vpack.c.bf16 %v219_v40, %v218_v39  ;;  %v220_v43 = vld [vmem:[%s3722_s4 + $0x30] sm:$0xff]  ;;  %v3359_v58 = vld [vmem:[%s3723_s5] ss:$0 sm:$0xff] }
   0x9   :  { %2848 = vmatpush3.bf16.msra.mxu1 %v3228_v12  ;;  %2550 = vmatprep.mubr.msk.f32.mxu0 %vm68_vm1, %v53_v28  ;;  %v221_v44 = vld [vmem:[%s3722_s4 + $0x38] sm:$0xff] }
   0xa   :  { %2861 = vmatprep.subr.bf16.mxu1 %v3115_v0  ;;  %2851 = vmatpush3.bf16.msra.mxu0 %v3274_v34  ;;  %v3317_v46 = vpack.c.bf16 %v221_v44, %v220_v43 }
   0xb   :  { %2852 = vmatprep.subr.bf16.mxu0 %v3115_v0 }
   0xc   :  { %2568 = vmatmul.mubr.f32.vlgmr.msra.gmra.mrb[0].mxu1 %v3118_v7  ;;  %2551 = vmatmul.mubr.msk.f32.gmra.mrb[2].mxu0 %vm68_vm1, %v54_v29 }
   0xd   :  { %2863 = vmatpush3.bf16.msra.mxu1 %v3215_v8  ;;  %2597 = vmatprep.mubr.msk.f32.mxu1 %vm3117_vm4, %v3118_v7 }
   0xe   :  { %2864 = vmatprep.subr.bf16.mxu1 %v3115_v0  ;;  %2553 = vmatprep.mubr.msk.f32.mxu0 %vm68_vm1, %v55_v30 }
   0xf   :  { %2854 = vmatpush3.bf16.msra.mxu0 %v3285_v37 }
  0x10   :  { %2554 = vmatmul.mubr.msk.f32.gmra.mrb[4].mxu0 %vm68_vm1, %v56_v36  ;;  %2855 = vmatprep.subr.bf16.mxu0 %v3115_v0 }
  0x11   :  { %2866 = vmatpush3.bf16.msra.mxu1 %v3228_v12  ;;  %2556 = vmatprep.mubr.msk.f32.mxu0 %vm68_vm1, %v57_v38 }
  0x12   :  { %2867 = vmatprep.subr.bf16.mxu1 %v3115_v0 }
  0x13   :  { %2857 = vmatpush3.bf16.msra.mxu0 %v3303_v42 }
  0x14   :  { %2557 = vmatmul.mubr.msk.f32.gmra.mrb[6].mxu0 %vm68_vm1, %v58_v41  ;;  %2858 = vmatprep.subr.bf16.mxu0 %v3115_v0 }
  0x15   :  { %2586 = vmatprep.mubr.msk.f32.mxu0 %vm3117_vm4, %v3118_v7 }
  0x17   :  { %2860 = vmatpush3.bf16.msra.mxu0 %v3317_v46 }
  0x18   :  { %2879 = vmatprep.subr.bf16.mxu0 %v3115_v0 }
  0xdb   :  { %v3247_v14 = vpop.f32.mrb[0].mxu0 }
  0xdc   :  { %v163_v15 = vpop.f32.mrb[1].mxu0  ;;  %v169_v57 = vadd.f32 %v3247_v14, %v3245_v13 }
  0xdd   :  { %v164_v16 = vadd.f32 %v3245_v13, %v163_v15 }
  0xdf   :  { %v300_v17 = vpop.f32.mrb[0].mxu1  ;;  %v3323_v49 = vpop.f32.mrb[2].mxu0 }
  0xe0   :  { %v304_v18 = vadd.f32 %v300_v17, %v164_v16  ;;  %v2569_v19 = vpop.f32.mrb[1].mxu1  ;;  %v3325_v50 = vpop.f32.mrb[3].mxu0 }
  0xe1   :  { %v174_v31 = vadd.f32 %v3245_v13, %v3325_v50 }
  0xe2   :  { %3013 = vtanh.f32 %v304_v18 }
  0xe3   :  { %v3327_v51 = vpop.f32.mrb[4].mxu0 }
  0xe4   :  { %v3329_v52 = vpop.f32.mrb[5].mxu0 }
  0xe7   :  { %v3331_v53 = vpop.f32.mrb[6].mxu0 }
  0xe8   :  { %v3333_v54 = vpop.f32.mrb[7].mxu0 }
  0xec   :  { %v3014_v20 = vpop.eup %3013 }
  0xed   :  { %310 = vrot.lane.b32.xlu0 %v3014_v20, %s3119_s29  ;;  %v306_v21 = vmul.f32 0.5, %v3014_v20 }
  0xef   :  { %v307_v22 = vadd.f32 0.5, %v306_v21 }
  0xf1   :  { %v308_v25 = vmul.f32 0.0, %v307_v22 }
 0x15f   :  { %v311_v23 = vpop.permute.xlu0 %310 }
 0x160   :  { %v313_v24 = vmul.f32 %v311_v23, %v307_v22 }
 0x162   :  { %315 = vrot.lane.b32.xlu0 %v313_v24, %s3120_s30 }
 0x1d4   :  { %v316_v26 = vpop.permute.xlu0 %315 }
 0x1d5   :  { %v3252_v27 = vadd.f32 %v316_v26, %v308_v25 }
 0x1d7   :  { %3015 = vtanh.f32 %v3252_v27 }
 0x1e1   :  { %v3016_v45 = vpop.eup %3015 }
 0x1e2   :  { %321 = vrot.lane.b32.xlu1 %v3016_v45, %s3119_s29 }
 0x254   :  { %v322_v47 = vpop.permute.xlu1 %321 }
 0x255   :  { %v324_v48 = vmul.f32 %v322_v47, %v307_v22 }
 0x257   :  { %326 = vrot.lane.b32.xlu1 %v324_v48, %s3120_s30 }
 0x2c9   :  { %v327_v55 = vpop.permute.xlu1 %326 }
 0x2ca   :  { %v329_v56 = vsel %vm230_vm5, %v327_v55, 0.0  ;;  %2598 = vmatmul.mubr.msk.f32.vlgmr.msra.gmra.mrb[2].mxu1 %vm230_vm5, %v327_v55 }
 0x2cb   :  { %2587 = vmatmul.mubr.msk.f32.vlgmr.msra.gmra.mrb[8].mxu0 %vm330_vm6, %v329_v56  ;;  %2869 = vmatpush3.bf16.msra.mxu1 %v3274_v34 }
 0x2cc   :  { %2870 = vmatprep.subr.bf16.mxu1 %v3115_v0  ;;  %2881 = vmatpush3.bf16.msra.mxu0 %v3215_v8 }
 0x2cd   :  { %2882 = vmatprep.subr.bf16.mxu0 %v3115_v0  ;;  %2627 = vmatprep.mubr.msk.f32.mxu0 %vm3117_vm4, %v3118_v7 }
 0x2ce   :  { %2616 = vmatprep.mubr.msk.f32.mxu1 %vm3117_vm4, %v3118_v7 }
 0x2cf   :  { %2872 = vmatpush3.bf16.msra.mxu1 %v3285_v37 }
 0x2d0   :  { %2873 = vmatprep.subr.bf16.mxu1 %v3115_v0  ;;  %2884 = vmatpush3.bf16.msra.mxu0 %v3228_v12 }
 0x2d1   :  { %2885 = vmatprep.subr.bf16.mxu0 %v3115_v0 }
 0x2d3   :  { %2875 = vmatpush3.bf16.msra.mxu1 %v3303_v42 }
 0x2d4   :  { %2876 = vmatprep.subr.bf16.mxu1 %v3115_v0 }
 0x2d7   :  { %2878 = vmatpush3.bf16.msra.mxu1 %v3317_v46 }
 0x2d8   :  { %2897 = vmatprep.subr.bf16.mxu1 %v3115_v0 }
 0x39d   :  { %v499_v59 = vpop.f32.mrb[2].mxu1 }
 0x39e   :  { %v503_v60 = vadd.f32 %v499_v59, %v169_v57  ;;  %v400_v61 = vpop.f32.mrb[8].mxu0  ;;  %v2599_v62 = vpop.f32.mrb[3].mxu1 }
 0x39f   :  { %v401_v63 = vadd.f32 %v3359_v58, %v400_v61  ;;  %v2588_v1 = vpop.f32.mrb[9].mxu0 }
 0x3a0   :  { %3017 = vtanh.f32 %v503_v60 }
 0x3a1   :  { %3019 = vtanh.f32 %v401_v63 }
 0x3aa   :  { %v3018_v2 = vpop.eup %3017 }
 0x3ab   :  { %v3020_v3 = vpop.eup %3019  ;;  %509 = vrot.lane.b32.xlu1 %v3018_v2, %s3119_s29  ;;  %v505_v4 = vmul.f32 0.5, %v3018_v2 }
 0x3ac   :  { %409 = vrot.lane.b32.xlu0 %v3020_v3, %s3119_s29  ;;  %v405_v5 = vmul.f32 0.5, %v3020_v3 }
 0x3ad   :  { %v506_v6 = vadd.f32 0.5, %v505_v4 }
 0x3ae   :  { %v406_v10 = vadd.f32 0.5, %v405_v5 }
 0x3af   :  { %v507_v16 = vmul.f32 %v506_v6, %v3252_v27 }
 0x3b0   :  { %v407_v18 = vmul.f32 0.0, %v406_v10 }
 0x41d   :  { %v510_v9 = vpop.permute.xlu1 %509 }
 0x41e   :  { %v512_v11 = vmul.f32 %v510_v9, %v506_v6  ;;  %v410_v14 = vpop.permute.xlu0 %409 }
 0x41f   :  { %v412_v15 = vmul.f32 %v410_v14, %v406_v10  ;;  %v179_v14 = vadd.f32 %v3323_v49, %v3245_v13 }
 0x420   :  { %514 = vrot.lane.b32.xlu1 %v512_v11, %s3120_s30 }
 0x421   :  { %414 = vrot.lane.b32.xlu0 %v412_v15, %s3120_s30 }
 0x492   :  { %v515_v17 = vpop.permute.xlu1 %514 }
 0x493   :  { %v517_v19 = vadd.f32 %v515_v17, %v507_v16  ;;  %v415_v20 = vpop.permute.xlu0 %414 }
 0x494   :  { %v417_v21 = vadd.f32 %v415_v20, %v407_v18 }
 0x495   :  { %3021 = vtanh.f32 %v517_v19 }
 0x496   :  { %3023 = vtanh.f32 %v417_v21 }
 0x49f   :  { %v3022_v22 = vpop.eup %3021 }
 0x4a0   :  { %v3024_v23 = vpop.eup %3023  ;;  %520 = vrot.lane.b32.xlu1 %v3022_v22, %s3119_s29 }
 0x4a1   :  { %420 = vrot.lane.b32.xlu0 %v3024_v23, %s3119_s29 }
 0x512   :  { %v521_v24 = vpop.permute.xlu1 %520 }
 0x513   :  { %v523_v25 = vmul.f32 %v521_v24, %v506_v6  ;;  %v421_v26 = vpop.permute.xlu0 %420 }
 0x514   :  { %v3369_v28 = vmul.f32 %v421_v26, %v406_v10 }
 0x515   :  { %525 = vrot.lane.b32.xlu0 %v523_v25, %s3120_s30 }
 0x516   :  { %528 = vrot.lane.b32.xlu1 %v3369_v28, %s3119_s29 }
 0x587   :  { %v526_v27 = vpop.permute.xlu0 %525 }
 0x588   :  { %v529_v29 = vpop.permute.xlu1 %528  ;;  %2628 = vmatmul.mubr.msk.f32.vlgmr.msra.gmra.mrb[10].mxu0 %vm230_vm5, %v526_v27 }
 0x589   :  { %v531_v30 = vsel %vm230_vm5, %v526_v27, %v529_v29  ;;  %2887 = vmatpush3.bf16.msra.mxu0 %v3274_v34  ;;  %2646 = vmatprep.mubr.msk.f32.mxu0 %vm3117_vm4, %v3118_v7 }
 0x58a   :  { %2617 = vmatmul.mubr.msk.f32.vlgmr.msra.gmra.mrb[4].mxu1 %vm330_vm6, %v531_v30  ;;  %2888 = vmatprep.subr.bf16.mxu0 %v3115_v0 }
 0x58b   :  { %2899 = vmatpush3.bf16.msra.mxu1 %v3215_v8  ;;  %2657 = vmatprep.mubr.msk.f32.mxu1 %vm3117_vm4, %v3118_v7 }
 0x58c   :  { %2900 = vmatprep.subr.bf16.mxu1 %v3115_v0 }
 0x58d   :  { %2890 = vmatpush3.bf16.msra.mxu0 %v3285_v37 }
 0x58e   :  { %2891 = vmatprep.subr.bf16.mxu0 %v3115_v0 }
 0x58f   :  { %2902 = vmatpush3.bf16.msra.mxu1 %v3228_v12 }
 0x590   :  { %2903 = vmatprep.subr.bf16.mxu1 %v3115_v0 }
 0x591   :  { %2893 = vmatpush3.bf16.msra.mxu0 %v3303_v42 }
 0x592   :  { %2894 = vmatprep.subr.bf16.mxu0 %v3115_v0 }
 0x595   :  { %2896 = vmatpush3.bf16.msra.mxu0 %v3317_v46 }
 0x596   :  { %2915 = vmatprep.subr.bf16.mxu0 %v3115_v0 }
 0x65b   :  { %v701_v32 = vpop.f32.mrb[10].mxu0 }
 0x65c   :  { %v705_v33 = vadd.f32 %v701_v32, %v174_v31  ;;  %v2629_v35 = vpop.f32.mrb[11].mxu0 }
 0x65d   :  { %v601_v36 = vpop.f32.mrb[4].mxu1 }
 0x65e   :  { %3025 = vtanh.f32 %v705_v33  ;;  %v602_v38 = vadd.f32 %v3359_v58, %v601_v36  ;;  %v2618_v39 = vpop.f32.mrb[5].mxu1 }
 0x660   :  { %3027 = vtanh.f32 %v602_v38 }
 0x668   :  { %v3026_v40 = vpop.eup %3025 }
 0x669   :  { %711 = vrot.lane.b32.xlu1 %v3026_v40, %s3119_s29  ;;  %v707_v43 = vmul.f32 0.5, %v3026_v40 }
 0x66a   :  { %v3028_v41 = vpop.eup %3027 }
 0x66b   :  { %610 = vrot.lane.b32.xlu0 %v3028_v41, %s3119_s29  ;;  %v606_v44 = vmul.f32 0.5, %v3028_v41  ;;  %v708_v45 = vadd.f32 0.5, %v707_v43 }
 0x66d   :  { %v607_v50 = vadd.f32 0.5, %v606_v44  ;;  %v709_v57 = vmul.f32 %v708_v45, %v517_v19 }
 0x66f   :  { %v608_v61 = vmul.f32 %v607_v50, %v417_v21 }
 0x6db   :  { %v712_v47 = vpop.permute.xlu1 %711 }
 0x6dc   :  { %v714_v48 = vmul.f32 %v712_v47, %v708_v45 }
 0x6dd   :  { %v611_v55 = vpop.permute.xlu0 %610 }
 0x6de   :  { %v613_v56 = vmul.f32 %v611_v55, %v607_v50  ;;  %716 = vrot.lane.b32.xlu1 %v714_v48, %s3120_s30  ;;  %v184_v55 = vadd.f32 %v3245_v13, %v3329_v52 }
 0x6e0   :  { %615 = vrot.lane.b32.xlu0 %v613_v56, %s3120_s30 }
 0x750   :  { %v717_v59 = vpop.permute.xlu1 %716 }
 0x751   :  { %v719_v60 = vadd.f32 %v717_v59, %v709_v57 }
 0x752   :  { %v616_v62 = vpop.permute.xlu0 %615 }
 0x753   :  { %3029 = vtanh.f32 %v719_v60  ;;  %v618_v63 = vadd.f32 %v616_v62, %v608_v61 }
 0x755   :  { %3031 = vtanh.f32 %v618_v63 }
 0x75d   :  { %v3030_v1 = vpop.eup %3029 }
 0x75e   :  { %722 = vrot.lane.b32.xlu1 %v3030_v1, %s3119_s29 }
 0x75f   :  { %v3032_v2 = vpop.eup %3031 }
 0x760   :  { %621 = vrot.lane.b32.xlu0 %v3032_v2, %s3119_s29 }
 0x7d0   :  { %v723_v3 = vpop.permute.xlu1 %722 }
 0x7d1   :  { %v725_v4 = vmul.f32 %v723_v3, %v708_v45 }
 0x7d2   :  { %v622_v5 = vpop.permute.xlu0 %621 }
 0x7d3   :  { %v3402_v6 = vmul.f32 %v622_v5, %v607_v50  ;;  %727 = vrot.lane.b32.xlu0 %v725_v4, %s3120_s30 }
 0x7d5   :  { %730 = vrot.lane.b32.xlu1 %v3402_v6, %s3119_s29 }
 0x845   :  { %v728_v9 = vpop.permute.xlu0 %727 }
 0x846   :  { %2658 = vmatmul.mubr.msk.f32.vlgmr.msra.gmra.mrb[6].mxu1 %vm230_vm5, %v728_v9 }
 0x847   :  { %v731_v10 = vpop.permute.xlu1 %730  ;;  %2905 = vmatpush3.bf16.msra.mxu1 %v3274_v34  ;;  %2676 = vmatprep.mubr.msk.f32.mxu1 %vm3117_vm4, %v3118_v7 }
 0x848   :  { %v733_v11 = vsel %vm230_vm5, %v728_v9, %v731_v10  ;;  %2906 = vmatprep.subr.bf16.mxu1 %v3115_v0 }
 0x849   :  { %2647 = vmatmul.mubr.msk.f32.vlgmr.msra.gmra.mrb[12].mxu0 %vm330_vm6, %v733_v11 }
 0x84a   :  { %2917 = vmatpush3.bf16.msra.mxu0 %v3215_v8  ;;  %2687 = vmatprep.mubr.msk.f32.mxu0 %vm3117_vm4, %v3118_v7 }
 0x84b   :  { %2908 = vmatpush3.bf16.msra.mxu1 %v3285_v37  ;;  %2918 = vmatprep.subr.bf16.mxu0 %v3115_v0 }
 0x84c   :  { %2909 = vmatprep.subr.bf16.mxu1 %v3115_v0 }
 0x84e   :  { %2920 = vmatpush3.bf16.msra.mxu0 %v3228_v12 }
 0x84f   :  { %2911 = vmatpush3.bf16.msra.mxu1 %v3303_v42  ;;  %2921 = vmatprep.subr.bf16.mxu0 %v3115_v0 }
 0x850   :  { %2912 = vmatprep.subr.bf16.mxu1 %v3115_v0 }
 0x853   :  { %2914 = vmatpush3.bf16.msra.mxu1 %v3317_v46 }
 0x854   :  { %2933 = vmatprep.subr.bf16.mxu1 %v3115_v0 }
 0x919   :  { %v903_v15 = vpop.f32.mrb[6].mxu1 }
 0x91a   :  { %v907_v16 = vadd.f32 %v903_v15, %v179_v14  ;;  %v2659_v17 = vpop.f32.mrb[7].mxu1 }
 0x91c   :  { %3033 = vtanh.f32 %v907_v16  ;;  %v803_v18 = vpop.f32.mrb[12].mxu0 }
 0x91d   :  { %v804_v19 = vadd.f32 %v3359_v58, %v803_v18  ;;  %v2648_v20 = vpop.f32.mrb[13].mxu0 }
 0x91f   :  { %3035 = vtanh.f32 %v804_v19 }
 0x926   :  { %v3034_v21 = vpop.eup %3033 }
 0x927   :  { %913 = vrot.lane.b32.xlu1 %v3034_v21, %s3119_s29  ;;  %v909_v23 = vmul.f32 0.5, %v3034_v21 }
 0x929   :  { %v3036_v22 = vpop.eup %3035  ;;  %v910_v25 = vadd.f32 0.5, %v909_v23 }
 0x92a   :  { %812 = vrot.lane.b32.xlu0 %v3036_v22, %s3119_s29  ;;  %v808_v24 = vmul.f32 0.5, %v3036_v22 }
 0x92b   :  { %v911_v31 = vmul.f32 %v910_v25, %v719_v60 }
 0x92c   :  { %v809_v27 = vadd.f32 0.5, %v808_v24 }
 0x92e   :  { %v810_v35 = vmul.f32 %v809_v27, %v618_v63 }
 0x999   :  { %v914_v26 = vpop.permute.xlu1 %913 }
 0x99a   :  { %v916_v49 = vmul.f32 %v914_v26, %v910_v25 }
 0x99c   :  { %918 = vrot.lane.b32.xlu1 %v916_v49, %s3120_s30  ;;  %v813_v29 = vpop.permute.xlu0 %812 }
 0x99d   :  { %v815_v30 = vmul.f32 %v813_v29, %v809_v27  ;;  %v189_v29 = vadd.f32 %v3327_v51, %v3245_v13 }
 0x99f   :  { %817 = vrot.lane.b32.xlu0 %v815_v30, %s3120_s30 }
 0xa0e   :  { %v919_v32 = vpop.permute.xlu1 %918 }
 0xa0f   :  { %v921_v33 = vadd.f32 %v919_v32, %v911_v31 }
 0xa11   :  { %3037 = vtanh.f32 %v921_v33  ;;  %v818_v36 = vpop.permute.xlu0 %817 }
 0xa12   :  { %v820_v38 = vadd.f32 %v818_v36, %v810_v35 }
 0xa14   :  { %3039 = vtanh.f32 %v820_v38 }
 0xa1b   :  { %v3038_v39 = vpop.eup %3037 }
 0xa1c   :  { %924 = vrot.lane.b32.xlu1 %v3038_v39, %s3119_s29 }
 0xa1e   :  { %v3040_v40 = vpop.eup %3039 }
 0xa1f   :  { %823 = vrot.lane.b32.xlu0 %v3040_v40, %s3119_s29 }
 0xa8e   :  { %v925_v41 = vpop.permute.xlu1 %924 }
 0xa8f   :  { %v927_v43 = vmul.f32 %v925_v41, %v910_v25 }
 0xa91   :  { %929 = vrot.lane.b32.xlu0 %v927_v43, %s3120_s30  ;;  %v824_v44 = vpop.permute.xlu0 %823 }
 0xa92   :  { %v3436_v45 = vmul.f32 %v824_v44, %v809_v27 }
 0xa94   :  { %932 = vrot.lane.b32.xlu1 %v3436_v45, %s3119_s29 }
 0xb03   :  { %v930_v47 = vpop.permute.xlu0 %929 }
 0xb04   :  { %2688 = vmatmul.mubr.msk.f32.vlgmr.msra.gmra.mrb[14].mxu0 %vm230_vm5, %v930_v47 }
 0xb05   :  { %2923 = vmatpush3.bf16.msra.mxu0 %v3274_v34  ;;  %2706 = vmatprep.mubr.msk.f32.mxu0 %vm3117_vm4, %v3118_v7 }
 0xb06   :  { %v933_v48 = vpop.permute.xlu1 %932  ;;  %2924 = vmatprep.subr.bf16.mxu0 %v3115_v0 }
 0xb07   :  { %v935_v50 = vsel %vm230_vm5, %v930_v47, %v933_v48 }
 0xb08   :  { %2677 = vmatmul.mubr.msk.f32.vlgmr.msra.gmra.mrb[8].mxu1 %vm330_vm6, %v935_v50 }
 0xb09   :  { %2935 = vmatpush3.bf16.msra.mxu1 %v3215_v8  ;;  %2926 = vmatpush3.bf16.msra.mxu0 %v3285_v37 }
 0xb0a   :  { %2936 = vmatprep.subr.bf16.mxu1 %v3115_v0  ;;  %2927 = vmatprep.subr.bf16.mxu0 %v3115_v0 }
 0xb0b   :  { %2717 = vmatprep.mubr.msk.f32.mxu1 %vm3117_vm4, %v3118_v7 }
 0xb0d   :  { %2938 = vmatpush3.bf16.msra.mxu1 %v3228_v12  ;;  %2929 = vmatpush3.bf16.msra.mxu0 %v3303_v42 }
 0xb0e   :  { %2930 = vmatprep.subr.bf16.mxu0 %v3115_v0  ;;  %2939 = vmatprep.subr.bf16.mxu1 %v3115_v0 }
 0xb11   :  { %2932 = vmatpush3.bf16.msra.mxu0 %v3317_v46 }
 0xb12   :  { %2951 = vmatprep.subr.bf16.mxu0 %v3115_v0 }
 0xbd7   :  { %v1105_v56 = vpop.f32.mrb[14].mxu0 }
 0xbd8   :  { %v1109_v57 = vadd.f32 %v1105_v56, %v184_v55  ;;  %v2689_v59 = vpop.f32.mrb[15].mxu0 }
 0xbda   :  { %3041 = vtanh.f32 %v1109_v57 }
 0xbdb   :  { %v1005_v60 = vpop.f32.mrb[8].mxu1 }
 0xbdc   :  { %v1006_v61 = vadd.f32 %v3359_v58, %v1005_v60  ;;  %v2678_v62 = vpop.f32.mrb[9].mxu1 }
 0xbde   :  { %3043 = vtanh.f32 %v1006_v61 }
 0xbe4   :  { %v3042_v63 = vpop.eup %3041 }
 0xbe5   :  { %1115 = vrot.lane.b32.xlu1 %v3042_v63, %s3119_s29  ;;  %v1111_v2 = vmul.f32 0.5, %v3042_v63 }
 0xbe7   :  { %v1112_v3 = vadd.f32 0.5, %v1111_v2 }
 0xbe8   :  { %v3044_v1 = vpop.eup %3043 }
 0xbe9   :  { %1014 = vrot.lane.b32.xlu0 %v3044_v1, %s3119_s29  ;;  %v1010_v4 = vmul.f32 0.5, %v3044_v1  ;;  %v1113_v14 = vmul.f32 %v1112_v3, %v921_v33 }
 0xbeb   :  { %v1011_v9 = vadd.f32 0.5, %v1010_v4 }
 0xbed   :  { %v1012_v17 = vmul.f32 %v1011_v9, %v820_v38 }
 0xc57   :  { %v1116_v5 = vpop.permute.xlu1 %1115 }
 0xc58   :  { %v1118_v52 = vmul.f32 %v1116_v5, %v1112_v3 }
 0xc5a   :  { %1120 = vrot.lane.b32.xlu1 %v1118_v52, %s3120_s30 }
 0xc5b   :  { %v1015_v10 = vpop.permute.xlu0 %1014 }
 0xc5c   :  { %v1017_v11 = vmul.f32 %v1015_v10, %v1011_v9  ;;  %v194_v10 = vadd.f32 %v3245_v13, %v3333_v54 }
 0xc5e   :  { %1019 = vrot.lane.b32.xlu0 %v1017_v11, %s3120_s30 }
 0xccc   :  { %v1121_v15 = vpop.permute.xlu1 %1120 }
 0xccd   :  { %v1123_v16 = vadd.f32 %v1121_v15, %v1113_v14 }
 0xccf   :  { %3045 = vtanh.f32 %v1123_v16 }
 0xcd0   :  { %v1020_v18 = vpop.permute.xlu0 %1019 }
 0xcd1   :  { %v1022_v19 = vadd.f32 %v1020_v18, %v1012_v17 }
 0xcd3   :  { %3047 = vtanh.f32 %v1022_v19 }
 0xcd9   :  { %v3046_v20 = vpop.eup %3045 }
 0xcda   :  { %1126 = vrot.lane.b32.xlu1 %v3046_v20, %s3119_s29 }
 0xcdd   :  { %v3048_v21 = vpop.eup %3047 }
 0xcde   :  { %1025 = vrot.lane.b32.xlu0 %v3048_v21, %s3119_s29 }
 0xd4c   :  { %v1127_v22 = vpop.permute.xlu1 %1126 }
 0xd4d   :  { %v1129_v23 = vmul.f32 %v1127_v22, %v1112_v3 }
 0xd4f   :  { %1131 = vrot.lane.b32.xlu0 %v1129_v23, %s3120_s30 }
 0xd50   :  { %v1026_v24 = vpop.permute.xlu0 %1025 }
 0xd51   :  { %v3469_v25 = vmul.f32 %v1026_v24, %v1011_v9 }
 0xd53   :  { %1134 = vrot.lane.b32.xlu1 %v3469_v25, %s3119_s29 }
 0xdc1   :  { %v1132_v26 = vpop.permute.xlu0 %1131 }
 0xdc2   :  { %2718 = vmatmul.mubr.msk.f32.vlgmr.msra.gmra.mrb[10].mxu1 %vm230_vm5, %v1132_v26 }
 0xdc3   :  { %2941 = vmatpush3.bf16.msra.mxu1 %v3274_v34  ;;  %2736 = vmatprep.mubr.msk.f32.mxu1 %vm3117_vm4, %v3118_v7 }
 0xdc4   :  { %2942 = vmatprep.subr.bf16.mxu1 %v3115_v0 }
 0xdc5   :  { %v1135_v49 = vpop.permute.xlu1 %1134 }
 0xdc6   :  { %v1137_v27 = vsel %vm230_vm5, %v1132_v26, %v1135_v49 }
 0xdc7   :  { %2707 = vmatmul.mubr.msk.f32.vlgmr.msra.gmra.mrb[16].mxu0 %vm330_vm6, %v1137_v27  ;;  %2944 = vmatpush3.bf16.msra.mxu1 %v3285_v37 }
 0xdc8   :  { %2953 = vmatpush3.bf16.msra.mxu0 %v3215_v8  ;;  %2945 = vmatprep.subr.bf16.mxu1 %v3115_v0 }
 0xdc9   :  { %2954 = vmatprep.subr.bf16.mxu0 %v3115_v0  ;;  %2747 = vmatprep.mubr.msk.f32.mxu0 %vm3117_vm4, %v3118_v7 }
 0xdcb   :  { %2947 = vmatpush3.bf16.msra.mxu1 %v3303_v42 }
 0xdcc   :  { %2956 = vmatpush3.bf16.msra.mxu0 %v3228_v12  ;;  %2948 = vmatprep.subr.bf16.mxu1 %v3115_v0 }
 0xdcd   :  { %2957 = vmatprep.subr.bf16.mxu0 %v3115_v0 }
 0xdcf   :  { %2950 = vmatpush3.bf16.msra.mxu1 %v3317_v46 }
 0xdd0   :  { %2969 = vmatprep.subr.bf16.mxu1 %v3115_v0 }
 0xe95   :  { %v1307_v30 = vpop.f32.mrb[10].mxu1 }
 0xe96   :  { %v1311_v31 = vadd.f32 %v1307_v30, %v189_v29  ;;  %v2719_v32 = vpop.f32.mrb[11].mxu1 }
 0xe98   :  { %3049 = vtanh.f32 %v1311_v31 }
 0xe9a   :  { %v1207_v33 = vpop.f32.mrb[16].mxu0 }
 0xe9b   :  { %v1208_v35 = vadd.f32 %v3359_v58, %v1207_v33  ;;  %v2708_v36 = vpop.f32.mrb[17].mxu0 }
 0xe9d   :  { %3051 = vtanh.f32 %v1208_v35 }
 0xea2   :  { %v3050_v38 = vpop.eup %3049 }
 0xea3   :  { %1317 = vrot.lane.b32.xlu1 %v3050_v38, %s3119_s29  ;;  %v1313_v40 = vmul.f32 0.5, %v3050_v38 }
 0xea5   :  { %v1314_v41 = vadd.f32 0.5, %v1313_v40 }
 0xea7   :  { %v3052_v39 = vpop.eup %3051  ;;  %v1315_v55 = vmul.f32 %v1314_v41, %v1123_v16 }
 0xea8   :  { %1216 = vrot.lane.b32.xlu0 %v3052_v39, %s3119_s29  ;;  %v1212_v44 = vmul.f32 0.5, %v3052_v39 }
 0xeaa   :  { %v1213_v47 = vadd.f32 0.5, %v1212_v44 }
 0xeac   :  { %v1214_v59 = vmul.f32 %v1213_v47, %v1022_v19 }
 0xf15   :  { %v1318_v43 = vpop.permute.xlu1 %1317 }
 0xf16   :  { %v1320_v51 = vmul.f32 %v1318_v43, %v1314_v41 }
 0xf18   :  { %1322 = vrot.lane.b32.xlu1 %v1320_v51, %s3120_s30 }
 0xf1a   :  { %v1217_v48 = vpop.permute.xlu0 %1216 }
 0xf1b   :  { %v1219_v50 = vmul.f32 %v1217_v48, %v1213_v47 }
 0xf1d   :  { %1221 = vrot.lane.b32.xlu0 %v1219_v50, %s3120_s30 }
 0xf8a   :  { %v1323_v56 = vpop.permute.xlu1 %1322 }
 0xf8b   :  { %v1325_v57 = vadd.f32 %v1323_v56, %v1315_v55 }
 0xf8d   :  { %3053 = vtanh.f32 %v1325_v57 }
 0xf8f   :  { %v1222_v60 = vpop.permute.xlu0 %1221 }
 0xf90   :  { %v1224_v61 = vadd.f32 %v1222_v60, %v1214_v59 }
 0xf92   :  { %3055 = vtanh.f32 %v1224_v61 }
 0xf97   :  { %v3054_v62 = vpop.eup %3053 }
 0xf98   :  { %1328 = vrot.lane.b32.xlu1 %v3054_v62, %s3119_s29 }
 0xf9c   :  { %v3056_v63 = vpop.eup %3055 }
 0xf9d   :  { %1227 = vrot.lane.b32.xlu0 %v3056_v63, %s3119_s29 }
0x100a   :  { %v1329_v1 = vpop.permute.xlu1 %1328 }
0x100b   :  { %v1331_v2 = vmul.f32 %v1329_v1, %v1314_v41 }
0x100d   :  { %1333 = vrot.lane.b32.xlu0 %v1331_v2, %s3120_s30 }
0x100f   :  { %v1228_v3 = vpop.permute.xlu0 %1227 }
0x1010   :  { %v3502_v4 = vmul.f32 %v1228_v3, %v1213_v47 }
0x1012   :  { %1336 = vrot.lane.b32.xlu1 %v3502_v4, %s3119_s29 }
0x107f   :  { %v1334_v5 = vpop.permute.xlu0 %1333 }
0x1080   :  { %2748 = vmatmul.mubr.msk.f32.vlgmr.msra.gmra.mrb[18].mxu0 %vm230_vm5, %v1334_v5 }
0x1081   :  { %2959 = vmatpush3.bf16.msra.mxu0 %v3274_v34  ;;  %2766 = vmatprep.mubr.msk.f32.mxu0 %vm3117_vm4, %v3118_v7 }
0x1082   :  { %2960 = vmatprep.subr.bf16.mxu0 %v3115_v0 }
0x1084   :  { %v1337_v52 = vpop.permute.xlu1 %1336 }
0x1085   :  { %v1339_v9 = vsel %vm230_vm5, %v1334_v5, %v1337_v52  ;;  %2962 = vmatpush3.bf16.msra.mxu0 %v3285_v37 }
0x1086   :  { %2737 = vmatmul.mubr.msk.f32.vlgmr.msra.gmra.mrb[12].mxu1 %vm330_vm6, %v1339_v9  ;;  %2963 = vmatprep.subr.bf16.mxu0 %v3115_v0 }
0x1087   :  { %2971 = vmatpush3.bf16.msra.mxu1 %v3215_v8  ;;  %2777 = vmatprep.mubr.msk.f32.mxu1 %vm3117_vm4, %v3118_v7 }
0x1088   :  { %2972 = vmatprep.subr.bf16.mxu1 %v3115_v0 }
0x1089   :  { %2965 = vmatpush3.bf16.msra.mxu0 %v3303_v42 }
0x108a   :  { %2966 = vmatprep.subr.bf16.mxu0 %v3115_v0 }
0x108b   :  { %2974 = vmatpush3.bf16.msra.mxu1 %v3228_v12 }
0x108c   :  { %2975 = vmatprep.subr.bf16.mxu1 %v3115_v0 }
0x108d   :  { %2968 = vmatpush3.bf16.msra.mxu0 %v3317_v46 }
0x1153   :  { %v1509_v11 = vpop.f32.mrb[18].mxu0 }
0x1154   :  { %v1513_v8 = vadd.f32 %v1509_v11, %v194_v10  ;;  %v2749_v14 = vpop.f32.mrb[19].mxu0 }
0x1156   :  { %3057 = vtanh.f32 %v1513_v8 }
0x1159   :  { %v1409_v15 = vpop.f32.mrb[12].mxu1 }
0x115a   :  { %v1410_v16 = vadd.f32 %v3359_v58, %v1409_v15  ;;  %v2738_v17 = vpop.f32.mrb[13].mxu1 }
0x115c   :  { %3059 = vtanh.f32 %v1410_v16 }
0x1160   :  { %v3058_v18 = vpop.eup %3057 }
0x1161   :  { %1519 = vrot.lane.b32.xlu1 %v3058_v18, %s3119_s29  ;;  %v1515_v19 = vmul.f32 0.5, %v3058_v18 }
0x1163   :  { %v1516_v20 = vadd.f32 0.5, %v1515_v19 }
0x1165   :  { %v1517_v49 = vmul.f32 %v1516_v20, %v1325_v57 }
0x1166   :  { %v3060_v12 = vpop.eup %3059 }
0x1167   :  { %1418 = vrot.lane.b32.xlu0 %v3060_v12, %s3119_s29  ;;  %v1414_v54 = vmul.f32 0.5, %v3060_v12 }
0x1169   :  { %v1415_v23 = vadd.f32 0.5, %v1414_v54 }
0x116b   :  { %v1416_v30 = vmul.f32 %v1415_v23, %v1224_v61 }
0x11d3   :  { %v1520_v21 = vpop.permute.xlu1 %1519 }
0x11d4   :  { %v1522_v22 = vmul.f32 %v1520_v21, %v1516_v20 }
0x11d6   :  { %1524 = vrot.lane.b32.xlu1 %v1522_v22, %s3120_s30 }
0x11d9   :  { %v1419_v24 = vpop.permute.xlu0 %1418 }
0x11da   :  { %v1421_v26 = vmul.f32 %v1419_v24, %v1415_v23 }
0x11dc   :  { %1423 = vrot.lane.b32.xlu0 %v1421_v26, %s3120_s30 }
0x1248   :  { %v1525_v27 = vpop.permute.xlu1 %1524 }
0x1249   :  { %v1527_v29 = vadd.f32 %v1525_v27, %v1517_v49  ;;  %v1851_v27 = vld [vmem:[%s3724_s6] sm:$0xff] }
0x124b   :  { %3061 = vtanh.f32 %v1527_v29 }
0x124e   :  { %v1424_v31 = vpop.permute.xlu0 %1423 }
0x124f   :  { %v1426_v32 = vadd.f32 %v1424_v31, %v1416_v30 }
0x1251   :  { %3063 = vtanh.f32 %v1426_v32 }
0x1255   :  { %v3062_v33 = vpop.eup %3061 }
0x1256   :  { %1530 = vrot.lane.b32.xlu1 %v3062_v33, %s3119_s29 }
0x125b   :  { %v3064_v35 = vpop.eup %3063 }
0x125c   :  { %1429 = vrot.lane.b32.xlu0 %v3064_v35, %s3119_s29 }
0x12c8   :  { %v1531_v36 = vpop.permute.xlu1 %1530 }
0x12c9   :  { %v1533_v38 = vmul.f32 %v1531_v36, %v1516_v20 }
0x12cb   :  { %1535 = vrot.lane.b32.xlu0 %v1533_v38, %s3120_s30 }
0x12ce   :  { %v1430_v39 = vpop.permute.xlu0 %1429 }
0x12cf   :  { %v3534_v40 = vmul.f32 %v1430_v39, %v1415_v23 }
0x12d1   :  { %1538 = vrot.lane.b32.xlu1 %v3534_v40, %s3119_s29 }
0x133d   :  { %v1536_v41 = vpop.permute.xlu0 %1535 }
0x133e   :  { %2778 = vmatmul.mubr.msk.f32.vlgmr.msra.gmra.mrb[14].mxu1 %vm230_vm5, %v1536_v41 }
0x133f   :  { %2977 = vmatpush3.bf16.msra.mxu1 %v3274_v34  ;;  %2796 = vmatprep.mubr.msk.f32.mxu1 %vm3117_vm4, %v3118_v7  ;;  %v199_v34 = vadd.f32 %v3331_v53, %v3245_v13 }
0x1340   :  { %2978 = vmatprep.subr.bf16.mxu1 %v3115_v0 }
0x1343   :  { %v1539_v43 = vpop.permute.xlu1 %1538  ;;  %2980 = vmatpush3.bf16.msra.mxu1 %v3285_v37 }
0x1344   :  { %v1541_v44 = vsel %vm230_vm5, %v1536_v41, %v1539_v43  ;;  %2981 = vmatprep.subr.bf16.mxu1 %v3115_v0 }
0x1345   :  { %2767 = vmatmul.mubr.msk.f32.vlgmr.msra.gmra.mrb[20].mxu0 %vm330_vm6, %v1541_v44 }
0x1347   :  { %2983 = vmatpush3.bf16.msra.mxu1 %v3303_v42 }
0x1348   :  { %2984 = vmatprep.subr.bf16.mxu1 %v3115_v0 }
0x134b   :  { %2986 = vmatpush3.bf16.msra.mxu1 %v3317_v46 }
0x134c   :  { %2995 = vmatprep.subr.bf16.mxu1 %v3115_v0 }
0x1411   :  { %v1711_v51 = vpop.f32.mrb[14].mxu1 }
0x1412   :  { %v1715_v47 = vadd.f32 %v1711_v51, %v199_v34  ;;  %v2779_v37 = vpop.f32.mrb[15].mxu1 }
0x1414   :  { %3065 = vtanh.f32 %v1715_v47 }
0x1418   :  { %v1611_v48 = vpop.f32.mrb[20].mxu0 }
0x1419   :  { %v1612_v50 = vadd.f32 %v3359_v58, %v1611_v48  ;;  %v2768_v55 = vpop.f32.mrb[21].mxu0 }
0x141a   :  { %v2385_v55 = vld [vmem:[%s3725_s7] ss:$0 sm:$0xff] }
0x141b   :  { %3067 = vtanh.f32 %v1612_v50 }
0x141e   :  { %v3066_v56 = vpop.eup %3065 }
0x141f   :  { %1721 = vrot.lane.b32.xlu1 %v3066_v56, %s3119_s29  ;;  %v1717_v46 = vmul.f32 0.5, %v3066_v56 }
0x1421   :  { %v1718_v57 = vadd.f32 0.5, %v1717_v46 }
0x1423   :  { %v1719_v63 = vmul.f32 %v1718_v57, %v1527_v29  ;;  %v1852_v29 = vld [vmem:[%s3724_s6 + $0x8] sm:$0xff] }
0x1425   :  { %v3068_v42 = vpop.eup %3067 }
0x1426   :  { %1620 = vrot.lane.b32.xlu0 %v3068_v42, %s3119_s29  ;;  %v1616_v13 = vmul.f32 0.5, %v3068_v42 }
0x1428   :  { %v1617_v53 = vadd.f32 0.5, %v1616_v13 }
0x142a   :  { %v1618_v3 = vmul.f32 %v1617_v53, %v1426_v32 }
0x1491   :  { %v1722_v59 = vpop.permute.xlu1 %1721 }
0x1492   :  { %v1724_v60 = vmul.f32 %v1722_v59, %v1718_v57 }
0x1494   :  { %1726 = vrot.lane.b32.xlu1 %v1724_v60, %s3120_s30  ;;  %v19_v60 = vstv %s3726_s9 }
0x1495   :  { %20 = vst [vmem:[#allocation4] sm:$0x1] %v19_v60 }
0x1498   :  { %v1621_v61 = vpop.permute.xlu0 %1620 }
0x1499   :  { %v1623_v62 = vmul.f32 %v1621_v61, %v1617_v53 }
0x149b   :  { %1625 = vrot.lane.b32.xlu0 %v1623_v62, %s3120_s30 }
0x1506   :  { %v1727_v1 = vpop.permute.xlu1 %1726 }
0x1507   :  { %v1729_v2 = vadd.f32 %v1727_v1, %v1719_v63 }
0x1509   :  { %3069 = vtanh.f32 %v1729_v2  ;;  %v2394_v2 = vld [vmem:[%s3727_s8] ss:$0 sm:$0xff] }
0x150d   :  { %v1626_v5 = vpop.permute.xlu0 %1625 }
0x150e   :  { %v1628_v52 = vadd.f32 %v1626_v5, %v1618_v3 }
0x1510   :  { %3071 = vtanh.f32 %v1628_v52 }
0x1513   :  { %v3070_v9 = vpop.eup %3069 }
0x1514   :  { %1732 = vrot.lane.b32.xlu1 %v3070_v9, %s3119_s29 }
0x151a   :  { %v3072_v10 = vpop.eup %3071 }
0x151b   :  { %1631 = vrot.lane.b32.xlu0 %v3072_v10, %s3119_s29 }
0x1586   :  { %v1733_v11 = vpop.permute.xlu1 %1732 }
0x1587   :  { %v1735_v8 = vmul.f32 %v1733_v11, %v1718_v57 }
0x1589   :  { %1737 = vrot.lane.b32.xlu0 %v1735_v8, %s3120_s30 }
0x158d   :  { %v1632_v14 = vpop.permute.xlu0 %1631 }
0x158e   :  { %v1634_v15 = vmul.f32 %v1632_v14, %v1617_v53 }
0x1590   :  { %1740 = vrot.lane.b32.xlu1 %v1634_v15, %s3119_s29 }
0x15fb   :  { %v1738_v16 = vpop.permute.xlu0 %1737 }
0x1602   :  { %v1741_v17 = vpop.permute.xlu1 %1740 }
0x1603   :  { %v1743_v18 = vsel %vm230_vm5, %v1738_v16, %v1741_v17 }
0x1604   :  { %2797 = vmatmul.mubr.msk.f32.vlgmr.msra.gmra.mrb[16].mxu1 %vm330_vm6, %v1743_v18 }
0x1605   :  { %2827 = vmatprep.mubr.msk.f32.mxu1 %vm3117_vm4, %v3118_v7 }
0x16d7   :  { %v1813_v12 = vpop.f32.mrb[16].mxu1 }
0x16d8   :  { %v1814_v19 = vadd.f32 %v3359_v58, %v1813_v12  ;;  %v2798_v20 = vpop.f32.mrb[17].mxu1 }
0x16da   :  { %3073 = vtanh.f32 %v1814_v19 }
0x16e4   :  { %v3074_v21 = vpop.eup %3073 }
0x16e5   :  { %1822 = vrot.lane.b32.xlu0 %v3074_v21, %s3119_s29  ;;  %v1818_v22 = vmul.f32 0.5, %v3074_v21 }
0x16e7   :  { %v1819_v54 = vadd.f32 0.5, %v1818_v22 }
0x16e9   :  { %v1820_v58 = vmul.f32 %v1819_v54, %v1628_v52 }
0x1757   :  { %v1823_v23 = vpop.permute.xlu0 %1822 }
0x1758   :  { %v1825_v24 = vmul.f32 %v1823_v23, %v1819_v54 }
0x175a   :  { %1827 = vrot.lane.b32.xlu1 %v1825_v24, %s3120_s30 }
0x175e   :  { %425 = vrot.lane.b32.xlu1 %v3369_v28, %s3120_s30  ;;  %v2987_v28 = vpack.c.bf16 %v1852_v29, %v1851_v27 }
0x1760   :  { %2988 = vmatprep.subr.bf16.mxu0 %v2987_v28 }
0x1761   :  { %2990 = vmatpush3.bf16.msra.mxu0 %v2987_v28 }
0x1762   :  { %828 = vrot.lane.b32.xlu1 %v3436_v45, %s3120_s30  ;;  %v1853_v45 = vld [vmem:[%s3724_s6 + $0x10] sm:$0xff] }
0x1766   :  { %1232 = vrot.lane.b32.xlu1 %v3502_v4, %s3120_s30  ;;  %v1854_v4 = vld [vmem:[%s3724_s6 + $0x18] sm:$0xff] }
0x1767   :  { %v2991_v31 = vpack.c.bf16 %v1854_v4, %v1853_v45  ;;  %v3121_v4 = vmov 0  }
0x1768   :  { %3012 = vset.pattern.permute.xlu1 %v3121_v4  ;;  %3011 = vset.pattern.permute.xlu0 %v3121_v4 }
0x1769   :  { %2992 = vmatprep.subr.bf16.mxu0 %v2991_v31 }
0x176a   :  { %1636 = vrot.lane.b32.xlu1 %v1634_v15, %s3120_s30  ;;  %2994 = vmatpush3.bf16.msra.mxu0 %v2991_v31 }
0x176b   :  { %3001 = vmatprep.subr.bf16.mxu0 %v3115_v0 }
0x17cc   :  { %v1828_v26 = vpop.permute.xlu1 %1827 }
0x17cd   :  { %v1830_v49 = vadd.f32 %v1828_v26, %v1820_v58 }
0x17cf   :  { %3075 = vtanh.f32 %v1830_v49 }
0x17d0   :  { %v426_v30 = vpop.permute.xlu1 %425 }
0x17d1   :  { %428 = vst.msk [vmem:[#allocation3] sm:$0xff] %vm230_vm5, %v426_v30 }
0x17d4   :  { %v829_v32 = vpop.permute.xlu1 %828 }
0x17d5   :  { %832 = vst.msk [vmem:[#allocation3 + $0x10] sm:$0xff] %vm230_vm5, %v829_v32 }
0x17d8   :  { %v1233_v33 = vpop.permute.xlu1 %1232  ;;  %v3591_v35 = vld [vmem:[#allocation3] sm:$0xff] }
0x17d9   :  { %v3076_v36 = vpop.eup %3075  ;;  %1236 = vst.msk [vmem:[#allocation3 + $0x20] sm:$0xff] %vm230_vm5, %v1233_v33  ;;  %2807 = vmatprep.mubr.msk.f32.mxu0 %vm230_vm5, %v3591_v35 }
0x17da   :  { %1833 = vrot.lane.b32.xlu0 %v3076_v36, %s3119_s29 }
0x17dc   :  { %v1637_v38 = vpop.permute.xlu1 %1636 }
0x17dd   :  { %1640 = vst.msk [vmem:[#allocation3 + $0x30] sm:$0xff] %vm230_vm5, %v1637_v38 }
0x17de   :  { %626 = vrot.lane.b32.xlu0 %v3402_v6, %s3120_s30  ;;  %v3612_v6 = vld [vmem:[#allocation3 + $0x10] sm:$0xff] }
0x17e2   :  { %1030 = vrot.lane.b32.xlu0 %v3469_v25, %s3120_s30 }
0x17e4   :  { %v3628_v37 = vld [vmem:[#allocation3 + $0x30] sm:$0xff] }
0x17e6   :  { %1434 = vrot.lane.b32.xlu0 %v3534_v40, %s3120_s30  ;;  %v3620_v40 = vld [vmem:[#allocation3 + $0x20] sm:$0xff] }
0x184c   :  { %v1834_v39 = vpop.permute.xlu0 %1833 }
0x184d   :  { %v1836_v41 = vmul.f32 %v1834_v39, %v1819_v54 }
0x184f   :  { %1838 = vrot.lane.b32.xlu0 %v1836_v41, %s3120_s30  ;;  %v2395_v41 = vld [vmem:[#allocation4] ss:$0 sm:$0xff] }
0x1850   :  { %v627_v43 = vpop.permute.xlu0 %626 }
0x1851   :  { %630 = vst.msk [vmem:[#allocation3 + $0x8] sm:$0xff] %vm230_vm5, %v627_v43 }
0x1854   :  { %v1031_v44 = vpop.permute.xlu0 %1030 }
0x1855   :  { %1034 = vst.msk [vmem:[#allocation3 + $0x18] sm:$0xff] %vm230_vm5, %v1031_v44 }
0x1858   :  { %v1435_v34 = vpop.permute.xlu0 %1434  ;;  %v3607_v51 = vld [vmem:[#allocation3 + $0x8] sm:$0xff] }
0x1859   :  { %1438 = vst.msk [vmem:[#allocation3 + $0x28] sm:$0xff] %vm230_vm5, %v1435_v34  ;;  %2808 = vmatmul.mubr.msk.f32.vlgmr.msra.gmra.mrb[22].mxu0 %vm230_vm5, %v3607_v51 }
0x185a   :  { %2810 = vmatprep.mubr.msk.f32.mxu0 %vm230_vm5, %v3612_v6 }
0x185c   :  { %v3616_v25 = vld [vmem:[#allocation3 + $0x18] sm:$0xff] }
0x185d   :  { %2811 = vmatmul.mubr.msk.f32.gmra.mrb[24].mxu0 %vm230_vm5, %v3616_v25 }
0x185e   :  { %2813 = vmatprep.mubr.msk.f32.mxu0 %vm230_vm5, %v3620_v40 }
0x1860   :  { %v3624_v47 = vld [vmem:[#allocation3 + $0x28] sm:$0xff] }
0x1861   :  { %2814 = vmatmul.mubr.msk.f32.gmra.mrb[26].mxu0 %vm230_vm5, %v3624_v47 }
0x1862   :  { %2816 = vmatprep.mubr.msk.f32.mxu0 %vm230_vm5, %v3628_v37 }
0x18c1   :  { %v1839_v48 = vpop.permute.xlu0 %1838 }
0x18c2   :  { %1842 = vst.msk [vmem:[#allocation3 + $0x38] sm:$0xff] %vm230_vm5, %v1839_v48 }
0x18c9   :  { %v3633_v50 = vld [vmem:[#allocation3 + $0x38] sm:$0xff] }
0x18ca   :  { %2817 = vmatmul.mubr.msk.f32.gmra.mrb[28].mxu0 %vm230_vm5, %v3633_v50 }
0x18cb   :  { %2834 = vmatprep.mubr.msk.f32.mxu0 %vm3117_vm4, %v3118_v7 }
0x192c   :  { %v2809_v56 = vpop.f32.mrb[22].mxu0 }
0x192d   :  { %v1958_v42 = vadd.f32 %v2809_v56, %v2385_v55  ;;  %v1952_v46 = vpop.f32.mrb[23].mxu0 }
0x192e   :  { %v1953_v57 = vadd.f32 %v2385_v55, %v1952_v46 }
0x192f   :  { %3077 = vtanh.f32 %v1958_v42 }
0x1930   :  { %3079 = vtanh.f32 %v1953_v57  ;;  %v2812_v59 = vpop.f32.mrb[24].mxu0 }
0x1931   :  { %v1968_v13 = vadd.f32 %v2812_v59, %v2385_v55  ;;  %v1962_v53 = vpop.f32.mrb[25].mxu0 }
0x1932   :  { %v1963_v61 = vadd.f32 %v2385_v55, %v1962_v53 }
0x1933   :  { %3081 = vtanh.f32 %v1968_v13 }
0x1934   :  { %3083 = vtanh.f32 %v1963_v61  ;;  %v2815_v7 = vpop.f32.mrb[26].mxu0 }
0x1935   :  { %v1978_v62 = vadd.f32 %v2815_v7, %v2385_v55  ;;  %v1972_v63 = vpop.f32.mrb[27].mxu0 }
0x1936   :  { %v1973_v1 = vadd.f32 %v2385_v55, %v1972_v63 }
0x1937   :  { %3085 = vtanh.f32 %v1978_v62 }
0x1938   :  { %3087 = vtanh.f32 %v1973_v1 }
0x1939   :  { %v3078_v3 = vpop.eup %3077 }
0x193a   :  { %v3080_v5 = vpop.eup %3079  ;;  %v2007_v52 = vmul.f32 %v3078_v3, %v2394_v2 }
0x193b   :  { %v2006_v9 = vmul.f32 %v3080_v5, %v2394_v2 }
0x193c   :  { %v2017_v10 = vsel %vm230_vm5, %v2007_v52, 0.0 }
0x193d   :  { %v3082_v11 = vpop.eup %3081  ;;  %2018 = vadd.xlane.f32.xlu0 %v2017_v10  ;;  %v2014_v8 = vsel %vm230_vm5, %v2006_v9, 0.0 }
0x193e   :  { %v3084_v14 = vpop.eup %3083  ;;  %2015 = vadd.xlane.f32.xlu1 %v2014_v8  ;;  %v2009_v15 = vmul.f32 %v3082_v11, %v2394_v2 }
0x193f   :  { %v2008_v16 = vmul.f32 %v3084_v14, %v2394_v2 }
0x1940   :  { %v2023_v17 = vsel %vm230_vm5, %v2009_v15, 0.0 }
0x1941   :  { %v3086_v18 = vpop.eup %3085  ;;  %v2020_v12 = vsel %vm230_vm5, %v2008_v16, 0.0 }
0x1942   :  { %v3088_v19 = vpop.eup %3087  ;;  %2021 = vadd.xlane.f32.xlu0 %v2020_v12  ;;  %2024 = vadd.xlane.f32.xlu1 %v2023_v17  ;;  %v2011_v20 = vmul.f32 %v3086_v18, %v2394_v2 }
0x1943   :  { %v2010_v21 = vmul.f32 %v3088_v19, %v2394_v2 }
0x1944   :  { %v2029_v22 = vsel %vm230_vm5, %v2011_v20, 0.0 }
0x1945   :  { %v2026_v54 = vsel %vm230_vm5, %v2010_v21, 0.0 }
0x1946   :  { %2027 = vadd.xlane.f32.xlu0 %v2026_v54  ;;  %2030 = vadd.xlane.f32.xlu1 %v2029_v22 }
0x199d   :  { %v2818_v23 = vpop.f32.mrb[28].mxu0 }
0x199e   :  { %v1988_v24 = vadd.f32 %v2818_v23, %v2385_v55  ;;  %v1982_v58 = vpop.f32.mrb[29].mxu0 }
0x199f   :  { %v1983_v26 = vadd.f32 %v2385_v55, %v1982_v58 }
0x19a0   :  { %3089 = vtanh.f32 %v1988_v24 }
0x19a1   :  { %3091 = vtanh.f32 %v1983_v26 }
0x19aa   :  { %v3090_v49 = vpop.eup %3089 }
0x19ab   :  { %v3092_v27 = vpop.eup %3091  ;;  %v2013_v29 = vmul.f32 %v3090_v49, %v2394_v2 }
0x19ac   :  { %v2012_v28 = vmul.f32 %v3092_v27, %v2394_v2 }
0x19ad   :  { %v2035_v30 = vsel %vm230_vm5, %v2013_v29, 0.0 }
0x19ae   :  { %2036 = vadd.xlane.f32.xlu1 %v2035_v30  ;;  %v2032_v45 = vsel %vm230_vm5, %v2012_v28, 0.0 }
0x19af   :  { %2033 = vadd.xlane.f32.xlu0 %v2032_v45 }
0x19ca   :  { %v2019_v31 = vpop.xlane.xlu0 %2018 }
0x19cb   :  { %v2016_v32 = vpop.xlane.xlu1 %2015  ;;  %v2046_v34 = vadd.f32 %v2395_v41, %v2019_v31 }
0x19cc   :  { %v2045_v48 = vadd.f32 %v2395_v41, %v2016_v32 }
0x19cd   :  { %v2055_v13 = vsel %vm2053_vm7, %v2046_v34, -inf }
0x19ce   :  { %v2054_v53 = vsel %vm2053_vm7, %v2045_v48, -inf }
0x19cf   :  { %v2022_v33 = vpop.xlane.xlu0 %2021  ;;  %v2025_v36 = vpop.xlane.xlu1 %2024 }
0x19d0   :  { %v2048_v55 = vadd.f32 %v2395_v41, %v2025_v36  ;;  %v2047_v56 = vadd.f32 %v2395_v41, %v2022_v33 }
0x19d2   :  { %v2057_v7 = vsel %vm2053_vm7, %v2048_v55, -inf  ;;  %v2056_v2 = vsel %vm2053_vm7, %v2047_v56, -inf }
0x19d3   :  { %v2028_v38 = vpop.xlane.xlu0 %2027  ;;  %v2031_v39 = vpop.xlane.xlu1 %2030 }
0x19d4   :  { %v2049_v43 = vadd.f32 %v2395_v41, %v2028_v38  ;;  %v2050_v44 = vadd.f32 %v2395_v41, %v2031_v39 }
0x19d6   :  { %v2058_v42 = vsel %vm2053_vm7, %v2049_v43, -inf  ;;  %v2060_v46 = vsel %vm2053_vm7, %v2050_v44, -inf }
0x19d7   :  { %v2059_v62 = vmax.f32 %v2054_v53, %v2058_v42  ;;  %v2061_v63 = vmax.f32 %v2055_v13, %v2060_v46 }
0x19d9   :  { %v2066_v9 = vmax.f32 %v2059_v62, %v2061_v63 }
0x1a3b   :  { %v2037_v57 = vpop.xlane.xlu1 %2036 }
0x1a3c   :  { %v2052_v59 = vadd.f32 %v2395_v41, %v2037_v57  ;;  %v2034_v60 = vpop.xlane.xlu0 %2033 }
0x1a3d   :  { %v2051_v61 = vadd.f32 %v2395_v41, %v2034_v60 }
0x1a3e   :  { %v2064_v1 = vsel %vm2053_vm7, %v2052_v59, -inf }
0x1a3f   :  { %v2065_v3 = vmax.f32 %v2057_v7, %v2064_v1  ;;  %v2062_v5 = vsel %vm2053_vm7, %v2051_v61, -inf  ;;  %v2180_v1 = vld [vmem:[%s3728_s10] sm:$0xff] }
0x1a40   :  { %v2063_v52 = vmax.f32 %v2056_v2, %v2062_v5  ;;  %v2181_v2 = vld [vmem:[%s3728_s10 + $0x8] sm:$0xff] }
0x1a42   :  { %v2067_v10 = vmax.f32 %v2063_v52, %v2065_v3  ;;  %v2996_v3 = vpack.c.bf16 %v2181_v2, %v2180_v1  ;;  %v2182_v52 = vld [vmem:[%s3728_s10 + $0x10] sm:$0xff] }
0x1a44   :  { %v2068_v11 = vmax.f32 %v2066_v9, %v2067_v10  ;;  %2997 = vmatpush3.bf16.msra.mxu1 %v2996_v3  ;;  %v2183_v9 = vld [vmem:[%s3728_s10 + $0x18] sm:$0xff] }
0x1a45   :  { %2998 = vmatprep.subr.bf16.mxu1 %v3115_v0  ;;  %v2999_v10 = vpack.c.bf16 %v2183_v9, %v2182_v52 }
0x1a46   :  { %v2071_v8 = vsub.f32 %v2047_v56, %v2068_v11  ;;  %v2069_v14 = vsub.f32 %v2045_v48, %v2068_v11  ;;  %v2070_v15 = vsub.f32 %v2046_v34, %v2068_v11  ;;  %v2072_v16 = vsub.f32 %v2048_v55, %v2068_v11 }
0x1a47   :  { %v2073_v12 = vsub.f32 %v2049_v43, %v2068_v11  ;;  %v2074_v20 = vsub.f32 %v2050_v44, %v2068_v11  ;;  %v2075_v22 = vsub.f32 %v2051_v61, %v2068_v11  ;;  %v2076_v23 = vsub.f32 %v2052_v59, %v2068_v11  ;;  %v2265_v11 = vld [vmem:[%s3729_s12] sm:$0xff] }
0x1a48   :  { %v2081_v17 = vmul.f32 1.442695, %v2071_v8  ;;  %v2077_v18 = vmul.f32 1.442695, %v2069_v14  ;;  %v2079_v19 = vmul.f32 1.442695, %v2070_v15  ;;  %3000 = vmatpush3.bf16.msra.mxu1 %v2999_v10 }
0x1a49   :  { %v2083_v21 = vmul.f32 1.442695, %v2072_v16  ;;  %v2085_v54 = vmul.f32 1.442695, %v2073_v12  ;;  %v2087_v24 = vmul.f32 1.442695, %v2074_v20 }
0x1a4a   :  { %3093 = vpow2.f32 %v2081_v17  ;;  %v2089_v58 = vmul.f32 1.442695, %v2075_v22  ;;  %v2091_v26 = vmul.f32 1.442695, %v2076_v23  ;;  %v2266_v8 = vld [vmem:[%s3729_s12 + $0x8] sm:$0xff] }
0x1a4b   :  { %3095 = vpow2.f32 %v2077_v18  ;;  %v3002_v14 = vpack.c.bf16 %v2266_v8, %v2265_v11 }
0x1a4c   :  { %3097 = vpow2.f32 %v2079_v19 }
0x1a4d   :  { %3099 = vpow2.f32 %v2083_v21  ;;  %3003 = vmatpush3.bf16.msra.mxu0 %v3002_v14 }
0x1a4e   :  { %3101 = vpow2.f32 %v2085_v54 }
0x1a4f   :  { %3103 = vpow2.f32 %v2087_v24 }
0x1a50   :  { %3105 = vpow2.f32 %v2089_v58 }
0x1a51   :  { %3107 = vpow2.f32 %v2091_v26 }
0x1a54   :  { %v3094_v49 = vpop.eup %3093 }
0x1a55   :  { %v3096_v27 = vpop.eup %3095  ;;  %v2096_v31 = vsel %vm2053_vm7, %v3094_v49, 0.0 }
0x1a56   :  { %v3098_v29 = vpop.eup %3097  ;;  %v2093_v28 = vsel %vm2053_vm7, %v3096_v27, 0.0 }
0x1a57   :  { %v2094_v30 = vsel %vm2053_vm7, %v3098_v29, 0.0  ;;  %v3100_v45 = vpop.eup %3099 }
0x1a58   :  { %v2095_v4 = vadd.f32 %v2094_v30, %v2093_v28  ;;  %v3102_v32 = vpop.eup %3101  ;;  %v2098_v36 = vsel %vm2053_vm7, %v3100_v45, 0.0 }
0x1a59   :  { %v3104_v38 = vpop.eup %3103  ;;  %v2100_v41 = vsel %vm2053_vm7, %v3102_v32, 0.0 }
0x1a5a   :  { %v2097_v33 = vadd.f32 %v2096_v31, %v2095_v4  ;;  %v3106_v43 = vpop.eup %3105  ;;  %v2102_v34 = vsel %vm2053_vm7, %v3104_v38, 0.0 }
0x1a5b   :  { %v3108_v48 = vpop.eup %3107  ;;  %v2104_v56 = vsel %vm2053_vm7, %v3106_v43, 0.0 }
0x1a5c   :  { %v2099_v39 = vadd.f32 %v2098_v36, %v2097_v33  ;;  %v2106_v46 = vsel %vm2053_vm7, %v3108_v48, 0.0  ;;  %v21_v36 = vstv %s3730_s13 }
0x1a5d   :  { %22 = vst [vmem:[#allocation5] sm:$0x1] %v21_v36 }
0x1a5e   :  { %v2101_v44 = vadd.f32 %v2100_v41, %v2099_v39 }
0x1a60   :  { %v2103_v55 = vadd.f32 %v2102_v34, %v2101_v44 }
0x1a62   :  { %v2105_v42 = vadd.f32 %v2104_v56, %v2103_v55 }
0x1a64   :  { %v2107_v57 = vadd.f32 %v2106_v46, %v2105_v42 }
0x1a66   :  { %3109 = vrcp.f32 %v2107_v57 }
0x1a70   :  { %v3110_v59 = vpop.eup %3109 }
0x1a71   :  { %v2110_v60 = vmul.f32 %v3110_v59, %v3098_v29  ;;  %v2109_v13 = vmul.f32 %v3110_v59, %v3096_v27  ;;  %v2111_v53 = vmul.f32 %v3110_v59, %v3094_v49  ;;  %v2112_v61 = vmul.f32 %v3110_v59, %v3100_v45 }
0x1a72   :  { %v2113_v7 = vmul.f32 %v3110_v59, %v3102_v32  ;;  %v2114_v62 = vmul.f32 %v3110_v59, %v3104_v38  ;;  %v2115_v63 = vmul.f32 %v3110_v59, %v3106_v43  ;;  %v2116_v5 = vmul.f32 %v3110_v59, %v3108_v48  ;;  %v2398_v43 = vld [vmem:[#allocation5] ss:$0 sm:$0xff] }
0x1a73   :  { %2124 = vperm.xlu1 %3012, %v2110_v60   ;;  %2119 = vperm.xlu0 %3011, %v2109_v13  }
0x1a77   :  { %2129 = vperm.xlu1 %3012, %v2111_v53  }
0x1a7b   :  { %2134 = vperm.xlu1 %3012, %v2112_v61  }
0x1a7f   :  { %2139 = vperm.xlu1 %3012, %v2113_v7  }
0x1a83   :  { %2144 = vperm.xlu1 %3012, %v2114_v62  }
0x1a87   :  { %2149 = vperm.xlu1 %3012, %v2115_v63  }
0x1a8b   :  { %2154 = vperm.xlu1 %3012, %v2116_v5  }
0x1af2   :  { %v2125_v0 = vpop.permute.xlu1 %2124  ;;  %v2120_v16 = vpop.permute.xlu0 %2119 }
0x1af3   :  { %v2158_v18 = vmul.f32 %v2125_v0, %v3607_v51  ;;  %v2157_v12 = vmul.f32 %v2120_v16, %v3591_v35 }
0x1af5   :  { %v2166_v21 = vsel %vm230_vm5, %v2158_v18, 0.0  ;;  %v2165_v22 = vsel %vm230_vm5, %v2157_v12, 0.0 }
0x1af6   :  { %v2130_v15 = vpop.permute.xlu1 %2129  ;;  %v2167_v58 = vadd.f32 %v2166_v21, %v2165_v22 }
0x1af7   :  { %v2159_v19 = vmul.f32 %v2130_v15, %v3612_v6 }
0x1af9   :  { %v2168_v23 = vsel %vm230_vm5, %v2159_v19, 0.0 }
0x1afa   :  { %v2135_v17 = vpop.permute.xlu1 %2134  ;;  %v2169_v35 = vadd.f32 %v2168_v23, %v2167_v58 }
0x1afb   :  { %v2160_v54 = vmul.f32 %v2135_v17, %v3616_v25 }
0x1afd   :  { %v2170_v49 = vsel %vm230_vm5, %v2160_v54, 0.0 }
0x1afe   :  { %v2140_v20 = vpop.permute.xlu1 %2139  ;;  %v2171_v27 = vadd.f32 %v2170_v49, %v2169_v35 }
0x1aff   :  { %v2161_v24 = vmul.f32 %v2140_v20, %v3620_v40 }
0x1b01   :  { %v2172_v6 = vsel %vm230_vm5, %v2161_v24, 0.0 }
0x1b02   :  { %v2145_v26 = vpop.permute.xlu1 %2144  ;;  %v2173_v25 = vadd.f32 %v2172_v6, %v2171_v27 }
0x1b03   :  { %v2162_v51 = vmul.f32 %v2145_v26, %v3624_v47 }
0x1b05   :  { %v2174_v28 = vsel %vm230_vm5, %v2162_v51, 0.0 }
0x1b06   :  { %v2150_v29 = vpop.permute.xlu1 %2149  ;;  %v2175_v4 = vadd.f32 %v2174_v28, %v2173_v25 }
0x1b07   :  { %v2163_v30 = vmul.f32 %v2150_v29, %v3628_v37  ;;  %v2396_v37 = vld [vmem:[%s3731_s11] ss:$0 sm:$0xff] }
0x1b09   :  { %v2176_v45 = vsel %vm230_vm5, %v2163_v30, 0.0 }
0x1b0a   :  { %v2155_v40 = vpop.permute.xlu1 %2154  ;;  %v2177_v32 = vadd.f32 %v2176_v45, %v2175_v4 }
0x1b0b   :  { %v2164_v31 = vmul.f32 %v2155_v40, %v3633_v50 }
0x1b0d   :  { %v2178_v33 = vsel %vm230_vm5, %v2164_v31, 0.0 }
0x1b0e   :  { %v2179_v47 = vadd.f32 %v2178_v33, %v2177_v32 }
0x1b10   :  { %2828 = vmatmul.mubr.msk.f32.vlgmr.msra.gmra.mrb[18].mxu1 %vm230_vm5, %v2179_v47 }
0x1be3   :  { %v2260_v38 = vpop.f32.mrb[18].mxu1 }
0x1be4   :  { %v2261_v39 = vadd.f32 %v2396_v37, %v2260_v38  ;;  %v2829_v41 = vpop.f32.mrb[19].mxu1 }
0x1be6   :  { %v2264_v50 = vmax.f32 %v2261_v39, 0.0 }
0x1be8   :  { %2835 = vmatmul.mubr.msk.f32.vlgmr.msra.gmra.mrb[30].mxu0 %vm2274_vm8, %v2264_v50 }
0x1cbb   :  { %v2344_v44 = vpop.f32.mrb[30].mxu0 }
0x1cbc   :  { %v2345_v34 = vadd.f32 %v2398_v43, %v2344_v44  ;;  %v2836_v48 = vpop.f32.mrb[31].mxu0 }
0x1cbe   :  { %v2400_v55 = vmul.f32 -1.442695, %v2345_v34 }
0x1cc0   :  { %3111 = vpow2.f32 %v2400_v55 }
0x1cca   :  { %v3112_v56 = vpop.eup %3111 }
0x1ccb   :  { %v2351_v42 = vadd.f32 1.0, %v3112_v56 }
0x1ccd   :  { %3113 = vrcp.f32 %v2351_v42 }
0x1cd7   :  { %v3114_v46 = vpop.eup %3113 }
0x1cd8   :  { %2354 = vst.msk [vmem:[%s3732_s14] sm:$0xff] %vm2053_vm7, %v3114_v46 }

</bundles_post_ra>
